<compile_context>
chip_gen: v5e
topology: v5e:2x2
jax: 0.10.0
libtpu: 0.0.40
codegen_flags: <defaults>
</compile_context>

<pallas_src>
import functools

import jax
import jax.numpy as jnp
from jax.experimental import pallas as pl
from jax.experimental.pallas import tpu as pltpu


# The 8 off-center 3x3 taps, in one fixed order shared by the wrapper-built
# masks and the in-kernel tap loop.
_TAPS = tuple((dh, dw) for dh in (-1, 0, 1) for dw in (-1, 0, 1)
              if (dh, dw) != (0, 0))


# ----------------------------------------------------------------------------
# Fused DenseBlock2_noExpand kernel (one grid step == IMGS_PER_STEP images)
# ----------------------------------------------------------------------------
def _dense_block2_kernel(x_ref, masks_ref,
                         w_dw1_ref, b_dw1_ref, w_pw1_ref,
                         w_dw2a_ref, b_dw2a_ref, w_dw2b_ref, b_dw2b_ref,
                         w_pw2a_ref, w_pw2b_ref, b_pw_ref,
                         o_ref, *, W, c1, mxu_dtype):
    """Layout (C, M): channels on sublanes, flattened (img, h, w) on lanes."""
    M = x_ref.shape[-1]
    x = x_ref[...]                         # (Cin, M) f32
    tap_masks = masks_ref[...]             # (8, M)  f32, one row per off-center tap
    b_pw = b_pw_ref[...]                   # (C1+C2, 1)

    def pw_dot(w_ref, v):
        # 1x1 conv == (Cout, Cin) @ (Cin, M) on the MXU, f32 accumulation.
        if mxu_dtype is jnp.float32:
            return jnp.dot(w_ref[...], v,
                           precision=jax.lax.Precision.HIGHEST,
                           preferred_element_type=jnp.float32)
        return jnp.dot(w_ref[...].astype(mxu_dtype), v.astype(mxu_dtype),
                       preferred_element_type=jnp.float32)

    def dw3x3(v, wb_pairs):
        # Depthwise 3x3 (+folded BN +ReLU) with a tap loop shared by any number
        # of weight sets: each roll+mask of `v` is computed exactly once.
        accs = [v * w[4] for (w, _) in wb_pairs]              # center taps
        for k, (dh, dw) in enumerate(_TAPS):
            shift = (-(dh * W + dw)) % M                      # neighbour offset
            sm = pltpu.roll(v, shift, axis=1) * tap_masks[k:k + 1, :]
            widx = (dh + 1) * 3 + (dw + 1)
            for i, (w, _) in enumerate(wb_pairs):
                accs[i] = accs[i] + sm * w[widx]
        return [jnp.maximum(a + b[...], 0.0) for a, (_, b) in zip(accs, wb_pairs)]

    # ---- depthwise: mobile_unit 1 and mobile_unit 2's x-branch share rolls ----
    h1, h2a = dw3x3(x, [(w_dw1_ref, b_dw1_ref), (w_dw2a_ref, b_dw2a_ref)])

    # ---- pointwise 1 (weights zero-padded to C1+C2 rows; bottom rows are 0) ----
    t1 = pw_dot(w_pw1_ref, h1)                                # (C1+C2, M)
    out1 = jnp.maximum(t1[:c1, :] + b_pw[:c1, :], 0.0)        # (C1, M)
    # NOTE: the mobile_unit residual (cin == cout, stride 1) is structurally
    # impossible for DenseBlock2_noExpand's channel sizes, so it is omitted.

    # ---- depthwise on out1 (mobile_unit 2's out1-branch) ----
    (h2b,) = dw3x3(out1, [(w_dw2b_ref, b_dw2b_ref)])

    # ---- pointwise 2 lands in rows C1: via the padded weights; cat(out1, out2)
    #      becomes one fused bias+ReLU and one unmasked full-block store. ----
    t = t1 + pw_dot(w_pw2a_ref, h2a) + pw_dot(w_pw2b_ref, h2b) + b_pw
    o_ref[...] = jnp.maximum(t, 0.0)


# ----------------------------------------------------------------------------
# Wrapper helpers
# ----------------------------------------------------------------------------
def _pick_imgs_per_step(batch, hw, lane_target):
    """Images per grid step: largest divisor of `batch` whose lane tile is
    128-aligned (or full-extent), fits the lane budget, and — when the batch
    allows — leaves >= 2 grid steps so both v7x TensorCores get work."""
    divisors = [d for d in range(1, batch + 1) if batch % d == 0]
    valid = [d for d in divisors if (d * hw) % 128 == 0 or d == batch]
    small = [d for d in valid if d * hw <= lane_target] or [min(valid)]
    multi = [d for d in small if batch // d >= 2]
    return max(multi) if multi else max(small)


def _build_tap_masks(H, W, imgs):
    """(8, imgs*H*W) f32 validity mask per off-center tap.  Built per image and
    tiled along lanes, so rolled taps never leak across image boundaries or the
    block-edge wraparound of pltpu.roll."""
    hw = H * W
    idx = jnp.arange(hw, dtype=jnp.int32)
    row = idx // W
    col = idx % W
    ones = jnp.ones((hw,), jnp.float32)
    row_m = {-1: (row >= 1).astype(jnp.float32), 0: ones,
             1: (row <= H - 2).astype(jnp.float32)}
    col_m = {-1: (col >= 1).astype(jnp.float32), 0: ones,
             1: (col <= W - 2).astype(jnp.float32)}
    m = jnp.stack([row_m[dh] * col_m[dw] for dh, dw in _TAPS], axis=0)   # (8, HW)
    return jnp.tile(m, (1, imgs))


# ----------------------------------------------------------------------------
# Channel-major core (chain consecutive blocks through this; no transposes)
# ----------------------------------------------------------------------------
def dense_block2_core(params, x_cm, *, batch, H, W,
                      imgs_per_step=None, lane_target=8192,
                      mxu_dtype=jnp.float32):
    """x_cm: (C, batch*H*W) channel-major -> (C1+C2, batch*H*W)."""
    C, total = x_cm.shape
    HW = H * W
    assert total == batch * HW
    C1, C2 = C * 3 // 4, C // 4
    Cf = C1 + C2

    imgs = imgs_per_step or _pick_imgs_per_step(batch, HW, lane_target)
    assert batch % imgs == 0
    LT = imgs * HW                                    # lanes per grid step
    grid = (batch // imgs,)

    masks = _build_tap_masks(H, W, imgs)              # (8, LT)

    # Depthwise weights (BN scale already folded): (9, ch) -> (9, ch, 1).
    w_dw1 = params["dw1_w"][:, :, None]
    b_dw1 = params["dw1_b"][:, None]
    w_dw2a = params["dw2_w"][:, :C, None]
    b_dw2a = params["dw2_b"][:C, None]
    w_dw2b = params["dw2_w"][:, C:, None]
    b_dw2b = params["dw2_b"][C:, None]

    # Pointwise weights zero-row-padded to the full output height: conv1 fills
    # rows 0:C1, conv2 rows C1:, so the kernel's final relu(sum) is already the
    # concatenated (out1, out2) block.  Padding rows cost nothing on the MXU.
    w_pw1 = jnp.concatenate(
        [params["pw1_w"], jnp.zeros((C2, C), jnp.float32)], axis=0)          # (Cf, C)
    w_pw2a = jnp.concatenate(
        [jnp.zeros((C1, C), jnp.float32), params["pw2_w"][:, :C]], axis=0)   # (Cf, C)
    w_pw2b = jnp.concatenate(
        [jnp.zeros((C1, C1), jnp.float32), params["pw2_w"][:, C:]], axis=0)  # (Cf, C1)
    b_pw = jnp.concatenate([params["pw1_b"], params["pw2_b"]])[:, None]      # (Cf, 1)

    kern = functools.partial(_dense_block2_kernel, W=W, c1=C1, mxu_dtype=mxu_dtype)
    rep2 = lambda n: (0, 0)
    rep3 = lambda n: (0, 0, 0)

    return pl.pallas_call(
        kern,
        out_shape=jax.ShapeDtypeStruct((Cf, batch * HW), jnp.float32),
        grid=grid,
        in_specs=[
            pl.BlockSpec((C, LT), lambda n: (0, n)),    # x
            pl.BlockSpec((8, LT), rep2),                # tap masks (resident)
            pl.BlockSpec((9, C, 1), rep3),              # dw1 weights
            pl.BlockSpec((C, 1), rep2),                 # dw1 bias
            pl.BlockSpec((Cf, C), rep2),                # pw1 weights (padded)
            pl.BlockSpec((9, C, 1), rep3),              # dw2 (x-part) weights
            pl.BlockSpec((C, 1), rep2),                 # dw2 (x-part) bias
            pl.BlockSpec((9, C1, 1), rep3),             # dw2 (out1-part) weights
            pl.BlockSpec((C1, 1), rep2),                # dw2 (out1-part) bias
            pl.BlockSpec((Cf, C), rep2),                # pw2 (x-part, padded)
            pl.BlockSpec((Cf, C1), rep2),               # pw2 (out1-part, padded)
            pl.BlockSpec((Cf, 1), rep2),                # pw bias (full)
        ],
        out_specs=pl.BlockSpec((Cf, LT), lambda n: (0, n)),
        # ~8K-lane tiles keep the per-step live set well under the 32 MiB
        # default scoped-VMEM budget even on v7x (64 MiB physical); raise
        # vmem_limit_bytes in CompilerParams only if lane_target is increased.
        compiler_params=pltpu.CompilerParams(dimension_semantics=("parallel",)),
    )(x_cm, masks, w_dw1, b_dw1, w_pw1,
      w_dw2a, b_dw2a, w_dw2b, b_dw2b, w_pw2a, w_pw2b, b_pw)


# ----------------------------------------------------------------------------
# NCHW convenience wrapper (layout change only at the edges)
# ----------------------------------------------------------------------------
def dense_block2_noexpand(params, x_nchw, *, imgs_per_step=None,
                          lane_target=8192, mxu_dtype=jnp.float32):
    N, C, H, W = x_nchw.shape
    C1, C2 = C * 3 // 4, C // 4
    x_cm = jnp.transpose(x_nchw, (1, 0, 2, 3)).reshape(C, N * H * W)
    out_cm = dense_block2_core(params, x_cm, batch=N, H=H, W=W,
                               imgs_per_step=imgs_per_step,
                               lane_target=lane_target, mxu_dtype=mxu_dtype)
    return jnp.transpose(out_cm.reshape(C1 + C2, N, H, W), (1, 0, 2, 3))


# ----------------------------------------------------------------------------
# Deterministic parameter construction (inference BN folded into weights)
# ----------------------------------------------------------------------------
def init_params(key, channel_in):
    c = channel_in
    c1 = c * 3 // 4
    c2 = c // 4
    cmid = c + c1                       # input channels of conv2 (= 7c/4)

    def dw_params(k, ch):               # depthwise 3x3 conv + folded BN
        kw, ks, kb = jax.random.split(k, 3)
        w = 0.3 * jax.random.normal(kw, (9, ch), jnp.float32)
        s = 1.0 + 0.1 * jax.random.normal(ks, (ch,), jnp.float32)
        b = 0.05 * jax.random.normal(kb, (ch,), jnp.float32)
        return w * s[None, :], b

    def pw_params(k, cin, cout):        # 1x1 conv + folded BN
        kw, ks, kb = jax.random.split(k, 3)
        w = jax.random.normal(kw, (cout, cin), jnp.float32) * (cin ** -0.5)
        s = 1.0 + 0.1 * jax.random.normal(ks, (cout,), jnp.float32)
        b = 0.05 * jax.random.normal(kb, (cout,), jnp.float32)
        return w * s[:, None], b

    k1, k2, k3, k4 = jax.random.split(key, 4)
    dw1_w, dw1_b = dw_params(k1, c)
    pw1_w, pw1_b = pw_params(k2, c, c1)
    dw2_w, dw2_b = dw_params(k3, cmid)
    pw2_w, pw2_b = pw_params(k4, cmid, c2)
    return {"dw1_w": dw1_w, "dw1_b": dw1_b, "pw1_w": pw1_w, "pw1_b": pw1_b,
            "dw2_w": dw2_w, "dw2_b": dw2_b, "pw2_w": pw2_w, "pw2_b": pw2_b}


# ----------------------------------------------------------------------------
# Pure-JAX reference (mirrors the PyTorch forward with folded BN)
# ----------------------------------------------------------------------------
def _dw3x3_ref(x, w9c, b):
    N, C, H, W = x.shape
    xp = jnp.pad(x, ((0, 0), (0, 0), (1, 1), (1, 1)))
    acc = jnp.zeros_like(x)
    for kh in range(3):
        for kw in range(3):
            acc = acc + xp[:, :, kh:kh + H, kw:kw + W] * w9c[kh * 3 + kw][None, :, None, None]
    return jax.nn.relu(acc + b[None, :, None, None])


def _pw_ref(x, w, b):
    y = jnp.einsum("oc,nchw->nohw", w, x, precision=jax.lax.Precision.HIGHEST)
    return jax.nn.relu(y + b[None, :, None, None])


def reference_forward(p, x):
    out1 = _pw_ref(_dw3x3_ref(x, p["dw1_w"], p["dw1_b"]), p["pw1_w"], p["pw1_b"])
    comb1 = jnp.concatenate([x, out1], axis=1)
    out2 = _pw_ref(_dw3x3_ref(comb1, p["dw2_w"], p["dw2_b"]), p["pw2_w"], p["pw2_b"])
    return jnp.concatenate([out1, out2], axis=1)


# ----------------------------------------------------------------------------
if __name__ == "__main__":
    key = jax.random.PRNGKey(0)
    kp, kx1, kx2 = jax.random.split(key, 3)

    C = 8
    params = init_params(kp, C)

    # Scenario 1: batch=2, 16x16 maps -> one image per step, grid=(2,).
    x1 = jax.random.normal(kx1, (2, C, 16, 16), jnp.float32)

    fwd_f32 = jax.jit(functools.partial(dense_block2_noexpand, mxu_dtype=jnp.float32))
    out = jax.block_until_ready(fwd_f32(params, x1))
    assert out.shape == x1.shape, out.shape
    ref = reference_forward(params, x1)
    err = float(jnp.max(jnp.abs(out - ref)))
    assert err < 1e-3, f"f32 max abs error vs reference: {err}"

    # bf16 MXU operands / f32 accumulation (v6e/v7x production path).
    fwd_bf16 = jax.jit(functools.partial(dense_block2_noexpand, mxu_dtype=jnp.bfloat16))
    out_bf = jax.block_until_ready(fwd_bf16(params, x1))
    assert bool(jnp.all(jnp.isfinite(out_bf)))
    rel = float(jnp.linalg.norm(out_bf - ref) / jnp.linalg.norm(ref))
    assert rel < 2e-2, f"bf16 relative error vs reference: {rel}"

    # Scenario 2: batch=8, 8x8 maps (HW=64 not 128-aligned by itself) ->
    # 4 images per grid step, grid=(2,); exercises multi-image tap masks.
    x2 = jax.random.normal(kx2, (8, C, 8, 8), jnp.float32)
    out2 = jax.block_until_ready(fwd_f32(params, x2))
    ref2 = reference_forward(params, x2)
    err2 = float(jnp.max(jnp.abs(out2 - ref2)))
    assert err2 < 1e-3, f"f32 (multi-image blocks) max abs error: {err2}"

    print("KERNEL_OK")
</pallas_src>

<mosaic_0001>
module attributes {stable_mosaic.version = 11 : i64} {
  func.func @_dense_block2_kernel(%arg0: i32, %arg1: memref<8x256xf32, #tpu.memory_space<vmem>>, %arg2: memref<8x256xf32, #tpu.memory_space<vmem>>, %arg3: memref<9x8x1xf32, #tpu.memory_space<vmem>>, %arg4: memref<8x1xf32, #tpu.memory_space<vmem>>, %arg5: memref<8x8xf32, #tpu.memory_space<vmem>>, %arg6: memref<9x8x1xf32, #tpu.memory_space<vmem>>, %arg7: memref<8x1xf32, #tpu.memory_space<vmem>>, %arg8: memref<9x6x1xf32, #tpu.memory_space<vmem>>, %arg9: memref<6x1xf32, #tpu.memory_space<vmem>>, %arg10: memref<8x8xf32, #tpu.memory_space<vmem>>, %arg11: memref<8x6xf32, #tpu.memory_space<vmem>>, %arg12: memref<8x1xf32, #tpu.memory_space<vmem>>, %arg13: memref<8x256xf32, #tpu.memory_space<vmem>>) attributes {dimension_semantics = [#tpu.dimension_semantics<parallel>], iteration_bounds = array<i64: 2>, scalar_prefetch = 0 : i64, scratch_operands = 0 : i64, tpu.core_type = #tpu.core_type<tc>, window_params = [{transform_indices = @transform_0, window_bounds = array<i64: 8, 256>}, {pipeline_mode = #tpu.pipeline_mode<synchronous>, transform_indices = @transform_1, window_bounds = array<i64: 8, 256>}, {pipeline_mode = #tpu.pipeline_mode<synchronous>, transform_indices = @transform_2, window_bounds = array<i64: 9, 8, 1>}, {pipeline_mode = #tpu.pipeline_mode<synchronous>, transform_indices = @transform_3, window_bounds = array<i64: 8, 1>}, {pipeline_mode = #tpu.pipeline_mode<synchronous>, transform_indices = @transform_4, window_bounds = array<i64: 8, 8>}, {pipeline_mode = #tpu.pipeline_mode<synchronous>, transform_indices = @transform_5, window_bounds = array<i64: 9, 8, 1>}, {pipeline_mode = #tpu.pipeline_mode<synchronous>, transform_indices = @transform_6, window_bounds = array<i64: 8, 1>}, {pipeline_mode = #tpu.pipeline_mode<synchronous>, transform_indices = @transform_7, window_bounds = array<i64: 9, 6, 1>}, {pipeline_mode = #tpu.pipeline_mode<synchronous>, transform_indices = @transform_8, window_bounds = array<i64: 6, 1>}, {pipeline_mode = #tpu.pipeline_mode<synchronous>, transform_indices = @transform_9, window_bounds = array<i64: 8, 8>}, {pipeline_mode = #tpu.pipeline_mode<synchronous>, transform_indices = @transform_10, window_bounds = array<i64: 8, 6>}, {pipeline_mode = #tpu.pipeline_mode<synchronous>, transform_indices = @transform_11, window_bounds = array<i64: 8, 1>}, {transform_indices = @transform_12, window_bounds = array<i64: 8, 256>}]} {
    %c0 = arith.constant 0 : index
    %c0_0 = arith.constant 0 : index
    %0 = vector.load %arg1[%c0, %c0_0] : memref<8x256xf32, #tpu.memory_space<vmem>>, vector<8x256xf32>
    %c0_1 = arith.constant 0 : index
    %c0_2 = arith.constant 0 : index
    %1 = vector.load %arg2[%c0_1, %c0_2] : memref<8x256xf32, #tpu.memory_space<vmem>>, vector<8x256xf32>
    %c0_3 = arith.constant 0 : index
    %c0_4 = arith.constant 0 : index
    %2 = vector.load %arg12[%c0_3, %c0_4] : memref<8x1xf32, #tpu.memory_space<vmem>>, vector<8x1xf32>
    %c4 = arith.constant 4 : index
    %c0_5 = arith.constant 0 : index
    %c0_6 = arith.constant 0 : index
    %3 = vector.load %arg3[%c4, %c0_5, %c0_6] : memref<9x8x1xf32, #tpu.memory_space<vmem>>, vector<1x8x1xf32>
    %4 = vector.shape_cast %3 : vector<1x8x1xf32> to vector<8x1xf32>
    %5 = vector.broadcast %4 : vector<8x1xf32> to vector<8x256xf32>
    %6 = arith.mulf %0, %5 : vector<8x256xf32>
    %c4_7 = arith.constant 4 : index
    %c0_8 = arith.constant 0 : index
    %c0_9 = arith.constant 0 : index
    %7 = vector.load %arg6[%c4_7, %c0_8, %c0_9] : memref<9x8x1xf32, #tpu.memory_space<vmem>>, vector<1x8x1xf32>
    %8 = vector.shape_cast %7 : vector<1x8x1xf32> to vector<8x1xf32>
    %9 = vector.broadcast %8 : vector<8x1xf32> to vector<8x256xf32>
    %10 = arith.mulf %0, %9 : vector<8x256xf32>
    %c17_i32 = arith.constant 17 : i32
    %11 = tpu.dynamic_rotate %0 by %c17_i32 dim 1 : vector<8x256xf32>, i32 -> vector<8x256xf32>
    %12 = vector.extract_strided_slice %1 {offsets = [0, 0], sizes = [1, 256], strides = [1, 1]} : vector<8x256xf32> to vector<1x256xf32>
    %13 = vector.broadcast %12 : vector<1x256xf32> to vector<8x256xf32>
    %14 = arith.mulf %11, %13 : vector<8x256xf32>
    %c0_10 = arith.constant 0 : index
    %c0_11 = arith.constant 0 : index
    %c0_12 = arith.constant 0 : index
    %15 = vector.load %arg3[%c0_10, %c0_11, %c0_12] : memref<9x8x1xf32, #tpu.memory_space<vmem>>, vector<1x8x1xf32>
    %16 = vector.shape_cast %15 : vector<1x8x1xf32> to vector<8x1xf32>
    %17 = vector.broadcast %16 : vector<8x1xf32> to vector<8x256xf32>
    %18 = arith.mulf %14, %17 : vector<8x256xf32>
    %19 = arith.addf %6, %18 : vector<8x256xf32>
    %c0_13 = arith.constant 0 : index
    %c0_14 = arith.constant 0 : index
    %c0_15 = arith.constant 0 : index
    %20 = vector.load %arg6[%c0_13, %c0_14, %c0_15] : memref<9x8x1xf32, #tpu.memory_space<vmem>>, vector<1x8x1xf32>
    %21 = vector.shape_cast %20 : vector<1x8x1xf32> to vector<8x1xf32>
    %22 = vector.broadcast %21 : vector<8x1xf32> to vector<8x256xf32>
    %23 = arith.mulf %14, %22 : vector<8x256xf32>
    %24 = arith.addf %10, %23 : vector<8x256xf32>
    %c16_i32 = arith.constant 16 : i32
    %25 = tpu.dynamic_rotate %0 by %c16_i32 dim 1 : vector<8x256xf32>, i32 -> vector<8x256xf32>
    %26 = vector.extract_strided_slice %1 {offsets = [1, 0], sizes = [1, 256], strides = [1, 1]} : vector<8x256xf32> to vector<1x256xf32>
    %27 = vector.broadcast %26 : vector<1x256xf32> to vector<8x256xf32>
    %28 = arith.mulf %25, %27 : vector<8x256xf32>
    %c1 = arith.constant 1 : index
    %c0_16 = arith.constant 0 : index
    %c0_17 = arith.constant 0 : index
    %29 = vector.load %arg3[%c1, %c0_16, %c0_17] : memref<9x8x1xf32, #tpu.memory_space<vmem>>, vector<1x8x1xf32>
    %30 = vector.shape_cast %29 : vector<1x8x1xf32> to vector<8x1xf32>
    %31 = vector.broadcast %30 : vector<8x1xf32> to vector<8x256xf32>
    %32 = arith.mulf %28, %31 : vector<8x256xf32>
    %33 = arith.addf %19, %32 : vector<8x256xf32>
    %c1_18 = arith.constant 1 : index
    %c0_19 = arith.constant 0 : index
    %c0_20 = arith.constant 0 : index
    %34 = vector.load %arg6[%c1_18, %c0_19, %c0_20] : memref<9x8x1xf32, #tpu.memory_space<vmem>>, vector<1x8x1xf32>
    %35 = vector.shape_cast %34 : vector<1x8x1xf32> to vector<8x1xf32>
    %36 = vector.broadcast %35 : vector<8x1xf32> to vector<8x256xf32>
    %37 = arith.mulf %28, %36 : vector<8x256xf32>
    %38 = arith.addf %24, %37 : vector<8x256xf32>
    %c15_i32 = arith.constant 15 : i32
    %39 = tpu.dynamic_rotate %0 by %c15_i32 dim 1 : vector<8x256xf32>, i32 -> vector<8x256xf32>
    %40 = vector.extract_strided_slice %1 {offsets = [2, 0], sizes = [1, 256], strides = [1, 1]} : vector<8x256xf32> to vector<1x256xf32>
    %41 = vector.broadcast %40 : vector<1x256xf32> to vector<8x256xf32>
    %42 = arith.mulf %39, %41 : vector<8x256xf32>
    %c2 = arith.constant 2 : index
    %c0_21 = arith.constant 0 : index
    %c0_22 = arith.constant 0 : index
    %43 = vector.load %arg3[%c2, %c0_21, %c0_22] : memref<9x8x1xf32, #tpu.memory_space<vmem>>, vector<1x8x1xf32>
    %44 = vector.shape_cast %43 : vector<1x8x1xf32> to vector<8x1xf32>
    %45 = vector.broadcast %44 : vector<8x1xf32> to vector<8x256xf32>
    %46 = arith.mulf %42, %45 : vector<8x256xf32>
    %47 = arith.addf %33, %46 : vector<8x256xf32>
    %c2_23 = arith.constant 2 : index
    %c0_24 = arith.constant 0 : index
    %c0_25 = arith.constant 0 : index
    %48 = vector.load %arg6[%c2_23, %c0_24, %c0_25] : memref<9x8x1xf32, #tpu.memory_space<vmem>>, vector<1x8x1xf32>
    %49 = vector.shape_cast %48 : vector<1x8x1xf32> to vector<8x1xf32>
    %50 = vector.broadcast %49 : vector<8x1xf32> to vector<8x256xf32>
    %51 = arith.mulf %42, %50 : vector<8x256xf32>
    %52 = arith.addf %38, %51 : vector<8x256xf32>
    %c1_i32 = arith.constant 1 : i32
    %53 = tpu.dynamic_rotate %0 by %c1_i32 dim 1 : vector<8x256xf32>, i32 -> vector<8x256xf32>
    %54 = vector.extract_strided_slice %1 {offsets = [3, 0], sizes = [1, 256], strides = [1, 1]} : vector<8x256xf32> to vector<1x256xf32>
    %55 = vector.broadcast %54 : vector<1x256xf32> to vector<8x256xf32>
    %56 = arith.mulf %53, %55 : vector<8x256xf32>
    %c3 = arith.constant 3 : index
    %c0_26 = arith.constant 0 : index
    %c0_27 = arith.constant 0 : index
    %57 = vector.load %arg3[%c3, %c0_26, %c0_27] : memref<9x8x1xf32, #tpu.memory_space<vmem>>, vector<1x8x1xf32>
    %58 = vector.shape_cast %57 : vector<1x8x1xf32> to vector<8x1xf32>
    %59 = vector.broadcast %58 : vector<8x1xf32> to vector<8x256xf32>
    %60 = arith.mulf %56, %59 : vector<8x256xf32>
    %61 = arith.addf %47, %60 : vector<8x256xf32>
    %c3_28 = arith.constant 3 : index
    %c0_29 = arith.constant 0 : index
    %c0_30 = arith.constant 0 : index
    %62 = vector.load %arg6[%c3_28, %c0_29, %c0_30] : memref<9x8x1xf32, #tpu.memory_space<vmem>>, vector<1x8x1xf32>
    %63 = vector.shape_cast %62 : vector<1x8x1xf32> to vector<8x1xf32>
    %64 = vector.broadcast %63 : vector<8x1xf32> to vector<8x256xf32>
    %65 = arith.mulf %56, %64 : vector<8x256xf32>
    %66 = arith.addf %52, %65 : vector<8x256xf32>
    %c255_i32 = arith.constant 255 : i32
    %67 = tpu.dynamic_rotate %0 by %c255_i32 dim 1 : vector<8x256xf32>, i32 -> vector<8x256xf32>
    %68 = vector.extract_strided_slice %1 {offsets = [4, 0], sizes = [1, 256], strides = [1, 1]} : vector<8x256xf32> to vector<1x256xf32>
    %69 = vector.broadcast %68 : vector<1x256xf32> to vector<8x256xf32>
    %70 = arith.mulf %67, %69 : vector<8x256xf32>
    %c5 = arith.constant 5 : index
    %c0_31 = arith.constant 0 : index
    %c0_32 = arith.constant 0 : index
    %71 = vector.load %arg3[%c5, %c0_31, %c0_32] : memref<9x8x1xf32, #tpu.memory_space<vmem>>, vector<1x8x1xf32>
    %72 = vector.shape_cast %71 : vector<1x8x1xf32> to vector<8x1xf32>
    %73 = vector.broadcast %72 : vector<8x1xf32> to vector<8x256xf32>
    %74 = arith.mulf %70, %73 : vector<8x256xf32>
    %75 = arith.addf %61, %74 : vector<8x256xf32>
    %c5_33 = arith.constant 5 : index
    %c0_34 = arith.constant 0 : index
    %c0_35 = arith.constant 0 : index
    %76 = vector.load %arg6[%c5_33, %c0_34, %c0_35] : memref<9x8x1xf32, #tpu.memory_space<vmem>>, vector<1x8x1xf32>
    %77 = vector.shape_cast %76 : vector<1x8x1xf32> to vector<8x1xf32>
    %78 = vector.broadcast %77 : vector<8x1xf32> to vector<8x256xf32>
    %79 = arith.mulf %70, %78 : vector<8x256xf32>
    %80 = arith.addf %66, %79 : vector<8x256xf32>
    %c241_i32 = arith.constant 241 : i32
    %81 = tpu.dynamic_rotate %0 by %c241_i32 dim 1 : vector<8x256xf32>, i32 -> vector<8x256xf32>
    %82 = vector.extract_strided_slice %1 {offsets = [5, 0], sizes = [1, 256], strides = [1, 1]} : vector<8x256xf32> to vector<1x256xf32>
    %83 = vector.broadcast %82 : vector<1x256xf32> to vector<8x256xf32>
    %84 = arith.mulf %81, %83 : vector<8x256xf32>
    %c6 = arith.constant 6 : index
    %c0_36 = arith.constant 0 : index
    %c0_37 = arith.constant 0 : index
    %85 = vector.load %arg3[%c6, %c0_36, %c0_37] : memref<9x8x1xf32, #tpu.memory_space<vmem>>, vector<1x8x1xf32>
    %86 = vector.shape_cast %85 : vector<1x8x1xf32> to vector<8x1xf32>
    %87 = vector.broadcast %86 : vector<8x1xf32> to vector<8x256xf32>
    %88 = arith.mulf %84, %87 : vector<8x256xf32>
    %89 = arith.addf %75, %88 : vector<8x256xf32>
    %c6_38 = arith.constant 6 : index
    %c0_39 = arith.constant 0 : index
    %c0_40 = arith.constant 0 : index
    %90 = vector.load %arg6[%c6_38, %c0_39, %c0_40] : memref<9x8x1xf32, #tpu.memory_space<vmem>>, vector<1x8x1xf32>
    %91 = vector.shape_cast %90 : vector<1x8x1xf32> to vector<8x1xf32>
    %92 = vector.broadcast %91 : vector<8x1xf32> to vector<8x256xf32>
    %93 = arith.mulf %84, %92 : vector<8x256xf32>
    %94 = arith.addf %80, %93 : vector<8x256xf32>
    %c240_i32 = arith.constant 240 : i32
    %95 = tpu.dynamic_rotate %0 by %c240_i32 dim 1 : vector<8x256xf32>, i32 -> vector<8x256xf32>
    %96 = vector.extract_strided_slice %1 {offsets = [6, 0], sizes = [1, 256], strides = [1, 1]} : vector<8x256xf32> to vector<1x256xf32>
    %97 = vector.broadcast %96 : vector<1x256xf32> to vector<8x256xf32>
    %98 = arith.mulf %95, %97 : vector<8x256xf32>
    %c7 = arith.constant 7 : index
    %c0_41 = arith.constant 0 : index
    %c0_42 = arith.constant 0 : index
    %99 = vector.load %arg3[%c7, %c0_41, %c0_42] : memref<9x8x1xf32, #tpu.memory_space<vmem>>, vector<1x8x1xf32>
    %100 = vector.shape_cast %99 : vector<1x8x1xf32> to vector<8x1xf32>
    %101 = vector.broadcast %100 : vector<8x1xf32> to vector<8x256xf32>
    %102 = arith.mulf %98, %101 : vector<8x256xf32>
    %103 = arith.addf %89, %102 : vector<8x256xf32>
    %c7_43 = arith.constant 7 : index
    %c0_44 = arith.constant 0 : index
    %c0_45 = arith.constant 0 : index
    %104 = vector.load %arg6[%c7_43, %c0_44, %c0_45] : memref<9x8x1xf32, #tpu.memory_space<vmem>>, vector<1x8x1xf32>
    %105 = vector.shape_cast %104 : vector<1x8x1xf32> to vector<8x1xf32>
    %106 = vector.broadcast %105 : vector<8x1xf32> to vector<8x256xf32>
    %107 = arith.mulf %98, %106 : vector<8x256xf32>
    %108 = arith.addf %94, %107 : vector<8x256xf32>
    %c239_i32 = arith.constant 239 : i32
    %109 = tpu.dynamic_rotate %0 by %c239_i32 dim 1 : vector<8x256xf32>, i32 -> vector<8x256xf32>
    %110 = vector.extract_strided_slice %1 {offsets = [7, 0], sizes = [1, 256], strides = [1, 1]} : vector<8x256xf32> to vector<1x256xf32>
    %111 = vector.broadcast %110 : vector<1x256xf32> to vector<8x256xf32>
    %112 = arith.mulf %109, %111 : vector<8x256xf32>
    %c8 = arith.constant 8 : index
    %c0_46 = arith.constant 0 : index
    %c0_47 = arith.constant 0 : index
    %113 = vector.load %arg3[%c8, %c0_46, %c0_47] : memref<9x8x1xf32, #tpu.memory_space<vmem>>, vector<1x8x1xf32>
    %114 = vector.shape_cast %113 : vector<1x8x1xf32> to vector<8x1xf32>
    %115 = vector.broadcast %114 : vector<8x1xf32> to vector<8x256xf32>
    %116 = arith.mulf %112, %115 : vector<8x256xf32>
    %117 = arith.addf %103, %116 : vector<8x256xf32>
    %c8_48 = arith.constant 8 : index
    %c0_49 = arith.constant 0 : index
    %c0_50 = arith.constant 0 : index
    %118 = vector.load %arg6[%c8_48, %c0_49, %c0_50] : memref<9x8x1xf32, #tpu.memory_space<vmem>>, vector<1x8x1xf32>
    %119 = vector.shape_cast %118 : vector<1x8x1xf32> to vector<8x1xf32>
    %120 = vector.broadcast %119 : vector<8x1xf32> to vector<8x256xf32>
    %121 = arith.mulf %112, %120 : vector<8x256xf32>
    %122 = arith.addf %108, %121 : vector<8x256xf32>
    %c0_51 = arith.constant 0 : index
    %c0_52 = arith.constant 0 : index
    %123 = vector.load %arg4[%c0_51, %c0_52] : memref<8x1xf32, #tpu.memory_space<vmem>>, vector<8x1xf32>
    %124 = vector.broadcast %123 : vector<8x1xf32> to vector<8x256xf32>
    %125 = arith.addf %117, %124 : vector<8x256xf32>
    %cst = arith.constant 0.000000e+00 : f32
    %126 = vector.broadcast %cst : f32 to vector<8x256xf32>
    %127 = arith.maximumf %125, %126 : vector<8x256xf32>
    %c0_53 = arith.constant 0 : index
    %c0_54 = arith.constant 0 : index
    %128 = vector.load %arg7[%c0_53, %c0_54] : memref<8x1xf32, #tpu.memory_space<vmem>>, vector<8x1xf32>
    %129 = vector.broadcast %128 : vector<8x1xf32> to vector<8x256xf32>
    %130 = arith.addf %122, %129 : vector<8x256xf32>
    %cst_55 = arith.constant 0.000000e+00 : f32
    %131 = vector.broadcast %cst_55 : f32 to vector<8x256xf32>
    %132 = arith.maximumf %130, %131 : vector<8x256xf32>
    %c0_56 = arith.constant 0 : index
    %c0_57 = arith.constant 0 : index
    %133 = vector.load %arg5[%c0_56, %c0_57] : memref<8x8xf32, #tpu.memory_space<vmem>>, vector<8x8xf32>
    %cst_58 = arith.constant dense<0.000000e+00> : vector<8x256xf32>
    %134 = tpu.matmul %133, %127, %cst_58 {dimension_numbers = #tpu.dot_dimension_numbers<[1], [0], [0], [1], [0, 0, 1, 1], [], []>, precision = #tpu.contract_precision<fp32>} : vector<8x8xf32>, vector<8x256xf32>, vector<8x256xf32> -> vector<8x256xf32>
    %135 = vector.extract_strided_slice %134 {offsets = [0, 0], sizes = [6, 256], strides = [1, 1]} : vector<8x256xf32> to vector<6x256xf32>
    %136 = vector.extract_strided_slice %2 {offsets = [0, 0], sizes = [6, 1], strides = [1, 1]} : vector<8x1xf32> to vector<6x1xf32>
    %137 = vector.broadcast %136 : vector<6x1xf32> to vector<6x256xf32>
    %138 = arith.addf %135, %137 : vector<6x256xf32>
    %cst_59 = arith.constant 0.000000e+00 : f32
    %139 = vector.broadcast %cst_59 : f32 to vector<6x256xf32>
    %140 = arith.maximumf %138, %139 : vector<6x256xf32>
    %c4_60 = arith.constant 4 : index
    %c0_61 = arith.constant 0 : index
    %c0_62 = arith.constant 0 : index
    %141 = vector.load %arg8[%c4_60, %c0_61, %c0_62] : memref<9x6x1xf32, #tpu.memory_space<vmem>>, vector<1x6x1xf32>
    %142 = vector.shape_cast %141 : vector<1x6x1xf32> to vector<6x1xf32>
    %143 = vector.broadcast %142 : vector<6x1xf32> to vector<6x256xf32>
    %144 = arith.mulf %140, %143 : vector<6x256xf32>
    %c17_i32_63 = arith.constant 17 : i32
    %145 = tpu.dynamic_rotate %140 by %c17_i32_63 dim 1 : vector<6x256xf32>, i32 -> vector<6x256xf32>
    %146 = vector.extract_strided_slice %1 {offsets = [0, 0], sizes = [1, 256], strides = [1, 1]} : vector<8x256xf32> to vector<1x256xf32>
    %147 = vector.broadcast %146 : vector<1x256xf32> to vector<6x256xf32>
    %148 = arith.mulf %145, %147 : vector<6x256xf32>
    %c0_64 = arith.constant 0 : index
    %c0_65 = arith.constant 0 : index
    %c0_66 = arith.constant 0 : index
    %149 = vector.load %arg8[%c0_64, %c0_65, %c0_66] : memref<9x6x1xf32, #tpu.memory_space<vmem>>, vector<1x6x1xf32>
    %150 = vector.shape_cast %149 : vector<1x6x1xf32> to vector<6x1xf32>
    %151 = vector.broadcast %150 : vector<6x1xf32> to vector<6x256xf32>
    %152 = arith.mulf %148, %151 : vector<6x256xf32>
    %153 = arith.addf %144, %152 : vector<6x256xf32>
    %c16_i32_67 = arith.constant 16 : i32
    %154 = tpu.dynamic_rotate %140 by %c16_i32_67 dim 1 : vector<6x256xf32>, i32 -> vector<6x256xf32>
    %155 = vector.extract_strided_slice %1 {offsets = [1, 0], sizes = [1, 256], strides = [1, 1]} : vector<8x256xf32> to vector<1x256xf32>
    %156 = vector.broadcast %155 : vector<1x256xf32> to vector<6x256xf32>
    %157 = arith.mulf %154, %156 : vector<6x256xf32>
    %c1_68 = arith.constant 1 : index
    %c0_69 = arith.constant 0 : index
    %c0_70 = arith.constant 0 : index
    %158 = vector.load %arg8[%c1_68, %c0_69, %c0_70] : memref<9x6x1xf32, #tpu.memory_space<vmem>>, vector<1x6x1xf32>
    %159 = vector.shape_cast %158 : vector<1x6x1xf32> to vector<6x1xf32>
    %160 = vector.broadcast %159 : vector<6x1xf32> to vector<6x256xf32>
    %161 = arith.mulf %157, %160 : vector<6x256xf32>
    %162 = arith.addf %153, %161 : vector<6x256xf32>
    %c15_i32_71 = arith.constant 15 : i32
    %163 = tpu.dynamic_rotate %140 by %c15_i32_71 dim 1 : vector<6x256xf32>, i32 -> vector<6x256xf32>
    %164 = vector.extract_strided_slice %1 {offsets = [2, 0], sizes = [1, 256], strides = [1, 1]} : vector<8x256xf32> to vector<1x256xf32>
    %165 = vector.broadcast %164 : vector<1x256xf32> to vector<6x256xf32>
    %166 = arith.mulf %163, %165 : vector<6x256xf32>
    %c2_72 = arith.constant 2 : index
    %c0_73 = arith.constant 0 : index
    %c0_74 = arith.constant 0 : index
    %167 = vector.load %arg8[%c2_72, %c0_73, %c0_74] : memref<9x6x1xf32, #tpu.memory_space<vmem>>, vector<1x6x1xf32>
    %168 = vector.shape_cast %167 : vector<1x6x1xf32> to vector<6x1xf32>
    %169 = vector.broadcast %168 : vector<6x1xf32> to vector<6x256xf32>
    %170 = arith.mulf %166, %169 : vector<6x256xf32>
    %171 = arith.addf %162, %170 : vector<6x256xf32>
    %c1_i32_75 = arith.constant 1 : i32
    %172 = tpu.dynamic_rotate %140 by %c1_i32_75 dim 1 : vector<6x256xf32>, i32 -> vector<6x256xf32>
    %173 = vector.extract_strided_slice %1 {offsets = [3, 0], sizes = [1, 256], strides = [1, 1]} : vector<8x256xf32> to vector<1x256xf32>
    %174 = vector.broadcast %173 : vector<1x256xf32> to vector<6x256xf32>
    %175 = arith.mulf %172, %174 : vector<6x256xf32>
    %c3_76 = arith.constant 3 : index
    %c0_77 = arith.constant 0 : index
    %c0_78 = arith.constant 0 : index
    %176 = vector.load %arg8[%c3_76, %c0_77, %c0_78] : memref<9x6x1xf32, #tpu.memory_space<vmem>>, vector<1x6x1xf32>
    %177 = vector.shape_cast %176 : vector<1x6x1xf32> to vector<6x1xf32>
    %178 = vector.broadcast %177 : vector<6x1xf32> to vector<6x256xf32>
    %179 = arith.mulf %175, %178 : vector<6x256xf32>
    %180 = arith.addf %171, %179 : vector<6x256xf32>
    %c255_i32_79 = arith.constant 255 : i32
    %181 = tpu.dynamic_rotate %140 by %c255_i32_79 dim 1 : vector<6x256xf32>, i32 -> vector<6x256xf32>
    %182 = vector.extract_strided_slice %1 {offsets = [4, 0], sizes = [1, 256], strides = [1, 1]} : vector<8x256xf32> to vector<1x256xf32>
    %183 = vector.broadcast %182 : vector<1x256xf32> to vector<6x256xf32>
    %184 = arith.mulf %181, %183 : vector<6x256xf32>
    %c5_80 = arith.constant 5 : index
    %c0_81 = arith.constant 0 : index
    %c0_82 = arith.constant 0 : index
    %185 = vector.load %arg8[%c5_80, %c0_81, %c0_82] : memref<9x6x1xf32, #tpu.memory_space<vmem>>, vector<1x6x1xf32>
    %186 = vector.shape_cast %185 : vector<1x6x1xf32> to vector<6x1xf32>
    %187 = vector.broadcast %186 : vector<6x1xf32> to vector<6x256xf32>
    %188 = arith.mulf %184, %187 : vector<6x256xf32>
    %189 = arith.addf %180, %188 : vector<6x256xf32>
    %c241_i32_83 = arith.constant 241 : i32
    %190 = tpu.dynamic_rotate %140 by %c241_i32_83 dim 1 : vector<6x256xf32>, i32 -> vector<6x256xf32>
    %191 = vector.extract_strided_slice %1 {offsets = [5, 0], sizes = [1, 256], strides = [1, 1]} : vector<8x256xf32> to vector<1x256xf32>
    %192 = vector.broadcast %191 : vector<1x256xf32> to vector<6x256xf32>
    %193 = arith.mulf %190, %192 : vector<6x256xf32>
    %c6_84 = arith.constant 6 : index
    %c0_85 = arith.constant 0 : index
    %c0_86 = arith.constant 0 : index
    %194 = vector.load %arg8[%c6_84, %c0_85, %c0_86] : memref<9x6x1xf32, #tpu.memory_space<vmem>>, vector<1x6x1xf32>
    %195 = vector.shape_cast %194 : vector<1x6x1xf32> to vector<6x1xf32>
    %196 = vector.broadcast %195 : vector<6x1xf32> to vector<6x256xf32>
    %197 = arith.mulf %193, %196 : vector<6x256xf32>
    %198 = arith.addf %189, %197 : vector<6x256xf32>
    %c240_i32_87 = arith.constant 240 : i32
    %199 = tpu.dynamic_rotate %140 by %c240_i32_87 dim 1 : vector<6x256xf32>, i32 -> vector<6x256xf32>
    %200 = vector.extract_strided_slice %1 {offsets = [6, 0], sizes = [1, 256], strides = [1, 1]} : vector<8x256xf32> to vector<1x256xf32>
    %201 = vector.broadcast %200 : vector<1x256xf32> to vector<6x256xf32>
    %202 = arith.mulf %199, %201 : vector<6x256xf32>
    %c7_88 = arith.constant 7 : index
    %c0_89 = arith.constant 0 : index
    %c0_90 = arith.constant 0 : index
    %203 = vector.load %arg8[%c7_88, %c0_89, %c0_90] : memref<9x6x1xf32, #tpu.memory_space<vmem>>, vector<1x6x1xf32>
    %204 = vector.shape_cast %203 : vector<1x6x1xf32> to vector<6x1xf32>
    %205 = vector.broadcast %204 : vector<6x1xf32> to vector<6x256xf32>
    %206 = arith.mulf %202, %205 : vector<6x256xf32>
    %207 = arith.addf %198, %206 : vector<6x256xf32>
    %c239_i32_91 = arith.constant 239 : i32
    %208 = tpu.dynamic_rotate %140 by %c239_i32_91 dim 1 : vector<6x256xf32>, i32 -> vector<6x256xf32>
    %209 = vector.extract_strided_slice %1 {offsets = [7, 0], sizes = [1, 256], strides = [1, 1]} : vector<8x256xf32> to vector<1x256xf32>
    %210 = vector.broadcast %209 : vector<1x256xf32> to vector<6x256xf32>
    %211 = arith.mulf %208, %210 : vector<6x256xf32>
    %c8_92 = arith.constant 8 : index
    %c0_93 = arith.constant 0 : index
    %c0_94 = arith.constant 0 : index
    %212 = vector.load %arg8[%c8_92, %c0_93, %c0_94] : memref<9x6x1xf32, #tpu.memory_space<vmem>>, vector<1x6x1xf32>
    %213 = vector.shape_cast %212 : vector<1x6x1xf32> to vector<6x1xf32>
    %214 = vector.broadcast %213 : vector<6x1xf32> to vector<6x256xf32>
    %215 = arith.mulf %211, %214 : vector<6x256xf32>
    %216 = arith.addf %207, %215 : vector<6x256xf32>
    %c0_95 = arith.constant 0 : index
    %c0_96 = arith.constant 0 : index
    %217 = vector.load %arg9[%c0_95, %c0_96] : memref<6x1xf32, #tpu.memory_space<vmem>>, vector<6x1xf32>
    %218 = vector.broadcast %217 : vector<6x1xf32> to vector<6x256xf32>
    %219 = arith.addf %216, %218 : vector<6x256xf32>
    %cst_97 = arith.constant 0.000000e+00 : f32
    %220 = vector.broadcast %cst_97 : f32 to vector<6x256xf32>
    %221 = arith.maximumf %219, %220 : vector<6x256xf32>
    %c0_98 = arith.constant 0 : index
    %c0_99 = arith.constant 0 : index
    %222 = vector.load %arg10[%c0_98, %c0_99] : memref<8x8xf32, #tpu.memory_space<vmem>>, vector<8x8xf32>
    %cst_100 = arith.constant dense<0.000000e+00> : vector<8x256xf32>
    %223 = tpu.matmul %222, %132, %cst_100 {dimension_numbers = #tpu.dot_dimension_numbers<[1], [0], [0], [1], [0, 0, 1, 1], [], []>, precision = #tpu.contract_precision<fp32>} : vector<8x8xf32>, vector<8x256xf32>, vector<8x256xf32> -> vector<8x256xf32>
    %224 = arith.addf %134, %223 : vector<8x256xf32>
    %c0_101 = arith.constant 0 : index
    %c0_102 = arith.constant 0 : index
    %225 = vector.load %arg11[%c0_101, %c0_102] : memref<8x6xf32, #tpu.memory_space<vmem>>, vector<8x6xf32>
    %cst_103 = arith.constant dense<0.000000e+00> : vector<8x256xf32>
    %226 = tpu.matmul %225, %221, %cst_103 {dimension_numbers = #tpu.dot_dimension_numbers<[1], [0], [0], [1], [0, 0, 1, 1], [], []>, precision = #tpu.contract_precision<fp32>} : vector<8x6xf32>, vector<6x256xf32>, vector<8x256xf32> -> vector<8x256xf32>
    %227 = arith.addf %224, %226 : vector<8x256xf32>
    %228 = vector.broadcast %2 : vector<8x1xf32> to vector<8x256xf32>
    %229 = arith.addf %227, %228 : vector<8x256xf32>
    %cst_104 = arith.constant 0.000000e+00 : f32
    %230 = vector.broadcast %cst_104 : f32 to vector<8x256xf32>
    %231 = arith.maximumf %229, %230 : vector<8x256xf32>
    %c0_105 = arith.constant 0 : index
    %c0_106 = arith.constant 0 : index
    %232 = vector.load %arg13[%c0_105, %c0_106] : memref<8x256xf32, #tpu.memory_space<vmem>>, vector<8x256xf32>
    tpu.vector_store %arg13[%c0_105, %c0_106], %231 {strides = array<i32>} : memref<8x256xf32, #tpu.memory_space<vmem>>, vector<8x256xf32>,
    return
  }
  func.func @transform_0(%arg0: i32) -> (i32, i32) {
    %c0_i32 = arith.constant 0 : i32
    %c0_i32_0 = arith.constant 0 : i32
    return %c0_i32, %arg0 : i32, i32
  }
  func.func @transform_1(%arg0: i32) -> (i32, i32) {
    %c0_i32 = arith.constant 0 : i32
    %c0_i32_0 = arith.constant 0 : i32
    %c0_i32_1 = arith.constant 0 : i32
    return %c0_i32, %c0_i32_0 : i32, i32
  }
  func.func @transform_2(%arg0: i32) -> (i32, i32, i32) {
    %c0_i32 = arith.constant 0 : i32
    %c0_i32_0 = arith.constant 0 : i32
    %c0_i32_1 = arith.constant 0 : i32
    %c0_i32_2 = arith.constant 0 : i32
    return %c0_i32, %c0_i32_0, %c0_i32_1 : i32, i32, i32
  }
  func.func @transform_3(%arg0: i32) -> (i32, i32) {
    %c0_i32 = arith.constant 0 : i32
    %c0_i32_0 = arith.constant 0 : i32
    %c0_i32_1 = arith.constant 0 : i32
    return %c0_i32, %c0_i32_0 : i32, i32
  }
  func.func @transform_4(%arg0: i32) -> (i32, i32) {
    %c0_i32 = arith.constant 0 : i32
    %c0_i32_0 = arith.constant 0 : i32
    %c0_i32_1 = arith.constant 0 : i32
    return %c0_i32, %c0_i32_0 : i32, i32
  }
  func.func @transform_5(%arg0: i32) -> (i32, i32, i32) {
    %c0_i32 = arith.constant 0 : i32
    %c0_i32_0 = arith.constant 0 : i32
    %c0_i32_1 = arith.constant 0 : i32
    %c0_i32_2 = arith.constant 0 : i32
    return %c0_i32, %c0_i32_0, %c0_i32_1 : i32, i32, i32
  }
  func.func @transform_6(%arg0: i32) -> (i32, i32) {
    %c0_i32 = arith.constant 0 : i32
    %c0_i32_0 = arith.constant 0 : i32
    %c0_i32_1 = arith.constant 0 : i32
    return %c0_i32, %c0_i32_0 : i32, i32
  }
  func.func @transform_7(%arg0: i32) -> (i32, i32, i32) {
    %c0_i32 = arith.constant 0 : i32
    %c0_i32_0 = arith.constant 0 : i32
    %c0_i32_1 = arith.constant 0 : i32
    %c0_i32_2 = arith.constant 0 : i32
    return %c0_i32, %c0_i32_0, %c0_i32_1 : i32, i32, i32
  }
  func.func @transform_8(%arg0: i32) -> (i32, i32) {
    %c0_i32 = arith.constant 0 : i32
    %c0_i32_0 = arith.constant 0 : i32
    %c0_i32_1 = arith.constant 0 : i32
    return %c0_i32, %c0_i32_0 : i32, i32
  }
  func.func @transform_9(%arg0: i32) -> (i32, i32) {
    %c0_i32 = arith.constant 0 : i32
    %c0_i32_0 = arith.constant 0 : i32
    %c0_i32_1 = arith.constant 0 : i32
    return %c0_i32, %c0_i32_0 : i32, i32
  }
  func.func @transform_10(%arg0: i32) -> (i32, i32) {
    %c0_i32 = arith.constant 0 : i32
    %c0_i32_0 = arith.constant 0 : i32
    %c0_i32_1 = arith.constant 0 : i32
    return %c0_i32, %c0_i32_0 : i32, i32
  }
  func.func @transform_11(%arg0: i32) -> (i32, i32) {
    %c0_i32 = arith.constant 0 : i32
    %c0_i32_0 = arith.constant 0 : i32
    %c0_i32_1 = arith.constant 0 : i32
    return %c0_i32, %c0_i32_0 : i32, i32
  }
  func.func @transform_12(%arg0: i32) -> (i32, i32) {
    %c0_i32 = arith.constant 0 : i32
    %c0_i32_0 = arith.constant 0 : i32
    return %c0_i32, %arg0 : i32, i32
  }
}

</mosaic_0001>

<bundles_post_ra>
// kernel: dense_block2_noexpand.1
= control target key start
LH: loop header
LB: loop body
LE: loop exit
PB: predicated region body
PF: predicated region fallthrough
CT: control target
= control target key end

     0   :  { %s2003_s21 = smov 0   ;;  %s2502_s0 = inlined_call_operand.vmem [shape: f32[8,512], index: 0, kind: input, shape index: {}]   ;;  %s2503_s1 = inlined_call_operand.vmem [shape: f32[8,256], index: 1, kind: input, shape index: {}]   ;;  %s2504_s2 = inlined_call_operand.vmem [shape: f32[9,8,1], index: 2, kind: input, shape index: {}]   ;;  %s2505_s3 = inlined_call_operand.vmem [shape: f32[8,1], index: 3, kind: input, shape index: {}]   ;;  %s2506_s4 = inlined_call_operand.vmem [shape: f32[8,8], index: 4, kind: input, shape index: {}]   ;;  %s2507_s5 = inlined_call_operand.vmem [shape: f32[9,8,1], index: 5, kind: input, shape index: {}]   ;;  %s2508_s6 = inlined_call_operand.vmem [shape: f32[8,1], index: 6, kind: input, shape index: {}]   ;;  %s2509_s7 = inlined_call_operand.vmem [shape: f32[9,6,1], index: 7, kind: input, shape index: {}]   ;;  %s2510_s8 = inlined_call_operand.vmem [shape: f32[6,1], index: 8, kind: input, shape index: {}]   ;;  %s2511_s9 = inlined_call_operand.vmem [shape: f32[8,8], index: 9, kind: input, shape index: {}]   ;;  %s2512_s10 = inlined_call_operand.vmem [shape: f32[8,6], index: 10, kind: input, shape index: {}]   ;;  %s2513_s11 = inlined_call_operand.vmem [shape: f32[8,1], index: 11, kind: input, shape index: {}]   ;;  %s2514_s12 = inlined_call_operand.vmem [shape: f32[8,512], index: 12, kind: output, shape index: {}]  }
   0x1 LB: > { %s1866_s22 = sadd.s32 4294967295, %s1927_s21   ;;  %p1870_p0 = scmp.ge.s32.totalorder %s1927_s21, 1  ;;  %s1927_s21 = sphi %s2003_s21, %s22_s21  }
   0x2   : > { %p363_p1 = scmp.lt.s32.totalorder %s1927_s21, 3 }
   0x4   : > { %p364_p2 = pnand %p1870_p0, %p363_p1 }
   0x5   : > { %s1871_s25 = sshll.u32 (!%p364_p2), %s1866_s22, 1  ;;  %s1930_s14 = smov (!%p364_p2), 16  }
   0x6   : > { %367 = sbr.rel (%p364_p2) target bundleno = 707 (0x2c3), region = 68  ;;  %p406_p3 = scmp.lt.s32.totalorder (!%p364_p2), %s1871_s25, 3 }
   0x7   : > { %s1931_s15 = smov (!%p364_p2), 17   ;;  %s1932_s20 = smov (!%p364_p2), 15  }
   0x8   : > { %s1933_s24 = smov (!%p364_p2), 1   ;;  %s1935_s16 = smov (!%p364_p2), 113  }
   0x9   : > { %s2518_s19 = smov (!%p364_p2), 112   ;;  %s2516_s27 = smov (!%p364_p2), 111  }
   0xb   : > { %v1875_v0 = vld [vmem:[%s2504_s2 + $0x20] sm:$0xff]  ;;  %v1929_v1 = vmov 0   ;;  %s2524_s25 = smov (!%p406_p3, %s1871_s25), 3  ;;  %v1877_v5 = vld [vmem:[%s2504_s2 + $0x8] sm:$0xff]  ;;  %v1879_v6 = vld [vmem:[%s2504_s2 + $0x10] sm:$0xff]  ;;  %v444_v43 = vlaneseq  ;;  %vm725_vm6 = vcmask 64512  }
   0xc   : > { %1918 = vset.pattern.permute.xlu2 %v1929_v1  ;;  %1920 = vset.pattern.permute.xlu1 %v1929_v1  ;;  %s2515_s26 = sshll.u32 %s2524_s25, 3  ;;  %v453_v3 = vld [vmem:[%s2504_s2] sm:$0xff]  ;;  %v1881_v7 = vld [vmem:[%s2504_s2 + $0x18] sm:$0xff]  ;;  %v1883_v8 = vld [vmem:[%s2504_s2 + $0x28] sm:$0xff]  ;;  %vm1499_vm9 = vcmask 48128   ;;  %vm1503_vm10 = vcmask 1045504  }
   0xd   : > { %426 = vperm.xlu2 %1918, %v1875_v0   ;;  %1919 = vset.pattern.permute.xlu0 %v1929_v1  ;;  %s409_s29 = scalar_lea.vmem %s2502_s0, %s2515_s26  ;;  %v1885_v9 = vld [vmem:[%s2504_s2 + $0x30] sm:$0xff]  ;;  %v1887_v10 = vld [vmem:[%s2504_s2 + $0x38] sm:$0xff]  ;;  %v421_v11 = vld [vmem:[%s2513_s11] sm:$0xff]  ;;  %v2144_v45 = vand.u32 127, %v444_v43  ;;  %s2522_s28 = sshll.u32 %s2524_s25, 3 }
   0xe   : > { %v2022_v2 = vld [vmem:[%s409_s29] sm:$0xff]  ;;  %v2031_v4 = vld [vmem:[%s409_s29 + $0x8] sm:$0xff]  ;;  %s1934_s29 = smov 127   ;;  %v1882_v17 = vld [vmem:[%s2507_s5 + $0x18] sm:$0xff]  ;;  %s415_s13 = scalar_lea.vmem %s2514_s12, %s2522_s28 }
   0xf   : > { %473 = vrot.lane.b32.xlu1 %v2022_v2, %s1930_s14  ;;  %440 = vrot.lane.b32.xlu0 %v2022_v2, %s1931_s15  ;;  %v704_v12 = vld [vmem:[%s2505_s3] sm:$0xff]  ;;  %v1878_v16 = vld [vmem:[%s2507_s5 + $0x8] sm:$0xff]  ;;  %vm446_vm0 = vcmp.lt.s32.totalorder %v2144_v45, 17  ;;  %vm477_vm1 = vcmp.lt.s32.totalorder %v2144_v45, 16  ;;  %vm510_vm2 = vcmp.lt.s32.totalorder %v2144_v45, 15  ;;  %vm543_vm3 = vcmp.lt.s32.totalorder %v2144_v45, 1 }
  0x10   : > { %v1889_v13 = vld [vmem:[%s2504_s2 + $0x40] sm:$0xff]  ;;  %v1880_v18 = vld [vmem:[%s2507_s5 + $0x10] sm:$0xff]  ;;  %v1884_v19 = vld [vmem:[%s2507_s5 + $0x28] sm:$0xff]  ;;  %vm576_vm4 = vcmp.lt.s32.totalorder %v2144_v45, 127  ;;  %vm609_vm5 = vcmp.lt.s32.totalorder %v2144_v45, 113  ;;  %vm642_vm7 = vcmp.lt.s32.totalorder %v2144_v45, 112 }
  0x11   : > { %v463_v14 = vld [vmem:[%s2507_s5] sm:$0xff]  ;;  %v1888_v20 = vld [vmem:[%s2507_s5 + $0x38] sm:$0xff]  ;;  %v1886_v21 = vld [vmem:[%s2507_s5 + $0x30] sm:$0xff]  ;;  %vm675_vm8 = vcmp.lt.s32.totalorder %v2144_v45, 111 }
  0x12   : > { %v1876_v15 = vld [vmem:[%s2507_s5 + $0x20] sm:$0xff]  ;;  %v1892_v28 = vld [vmem:[%s2509_s7 + $0x8] sm:$0x3f]  ;;  %v1893_v32 = vld [vmem:[%s2509_s7 + $0x10] sm:$0x3f] }
  0x13   : > { %v1890_v22 = vld [vmem:[%s2507_s5 + $0x40] sm:$0xff]  ;;  %v1894_v36 = vld [vmem:[%s2509_s7 + $0x18] sm:$0x3f]  ;;  %v1895_v40 = vld [vmem:[%s2509_s7 + $0x28] sm:$0x3f] }
  0x14   : > { %v714_v24 = vld [vmem:[%s2508_s6] sm:$0xff]  ;;  %v2154_v49 = vld [vmem:[%s2503_s1 + $0x8] sm:$0xff] }
  0x15   : > { %456 = vperm.xlu2 %1918, %v453_v3   ;;  %v1891_v25 = vld [vmem:[%s2509_s7 + $0x20] sm:$0x3f]  ;;  %v450_v52 = vperm.slane %v2154_v49, 0  ;;  %v481_v58 = vperm.slane %v2154_v49, 1 }
  0x16   : > { %v1047_v27 = vld [vmem:[%s2509_s7] sm:$0x3f] }
  0x17   : > { %475 = vrot.lane.b32.xlu1 %v2031_v4, %s1930_s14  ;;  %442 = vrot.lane.b32.xlu0 %v2031_v4, %s1931_s15  ;;  %v2149_v48 = vld [vmem:[%s2503_s1] sm:$0xff] }
  0x18   : > { %v449_v50 = vperm.slane %v2149_v48, 0  ;;  %v480_v55 = vperm.slane %v2149_v48, 1  ;;  %v513_v3 = vperm.slane %v2149_v48, 2 }
  0x1d   : > { %488 = vperm.xlu2 %1918, %v1877_v5   ;;  %v514_v5 = vperm.slane %v2154_v49, 2 }
  0x1f   : > { %508 = vrot.lane.b32.xlu1 %v2031_v4, %s1932_s20  ;;  %506 = vrot.lane.b32.xlu0 %v2022_v2, %s1932_s20 }
  0x25   : > { %521 = vperm.xlu2 %1918, %v1879_v6  }
  0x27   : > { %541 = vrot.lane.b32.xlu1 %v2031_v4, %s1933_s24  ;;  %539 = vrot.lane.b32.xlu0 %v2022_v2, %s1933_s24 }
  0x2d   : > { %554 = vperm.xlu2 %1918, %v1881_v7  }
  0x2f   : > { %574 = vrot.lane.b32.xlu1 %v2031_v4, %s1934_s29  ;;  %572 = vrot.lane.b32.xlu0 %v2022_v2, %s1934_s29 }
  0x35   : > { %587 = vperm.xlu2 %1918, %v1883_v8  }
  0x37   : > { %607 = vrot.lane.b32.xlu1 %v2031_v4, %s1935_s16  ;;  %605 = vrot.lane.b32.xlu0 %v2022_v2, %s1935_s16 }
  0x3d   : > { %620 = vperm.xlu2 %1918, %v1885_v9  }
  0x3f   : > { %640 = vrot.lane.b32.xlu1 %v2031_v4, %s2518_s19  ;;  %638 = vrot.lane.b32.xlu0 %v2022_v2, %s2518_s19 }
  0x45   : > { %653 = vperm.xlu2 %1918, %v1887_v10  }
  0x47   : > { %673 = vrot.lane.b32.xlu1 %v2031_v4, %s2516_s27  ;;  %671 = vrot.lane.b32.xlu0 %v2022_v2, %s2516_s27 }
  0x4d   : > { %1023 = vperm.xlu2 %1918, %v421_v11   ;;  %v546_v11 = vperm.slane %v2149_v48, 3 }
  0x4f   : > { %707 = vperm.xlu1 %1920, %v704_v12   ;;  %686 = vperm.xlu0 %1919, %v1889_v13   ;;  %v547_v12 = vperm.slane %v2154_v49, 3 }
  0x55   : > { %466 = vperm.xlu2 %1918, %v463_v14   ;;  %v579_v14 = vperm.slane %v2149_v48, 4 }
  0x57   : > { %435 = vperm.xlu1 %1920, %v1876_v15   ;;  %499 = vperm.xlu0 %1919, %v1878_v16   ;;  %v580_v15 = vperm.slane %v2154_v49, 4  ;;  %v612_v16 = vperm.slane %v2149_v48, 5 }
  0x5d   : > { %565 = vperm.xlu2 %1918, %v1882_v17  }
  0x5f   : > { %532 = vperm.xlu1 %1920, %v1880_v18   ;;  %598 = vperm.xlu0 %1919, %v1884_v19  }
  0x65   : > { %664 = vperm.xlu2 %1918, %v1888_v20  }
  0x67   : > { %631 = vperm.xlu1 %1920, %v1886_v21   ;;  %697 = vperm.xlu0 %1919, %v1890_v22   ;;  %v427_v23 = vpop.permute.xlu2 %426 }
  0x68   : > { %v429_v63 = vmul.f32 %v427_v23, %v2022_v2  ;;  %v430_v0 = vmul.f32 %v427_v23, %v2031_v4 }
  0x6f   : > { %717 = vperm.xlu1 %1920, %v714_v24   ;;  %1034 = vperm.xlu0 %1919, %v1891_v25   ;;  %v457_v26 = vpop.permute.xlu2 %456 }
  0x77   : > { %1050 = vperm.xlu1 %1920, %v1047_v27   ;;  %v2127_v29 = vpop.permute.xlu2 %488 }
  0x7f   : > { %1069 = vperm.xlu1 %1920, %v1892_v28   ;;  %v2132_v33 = vpop.permute.xlu2 %521 }
  0x81   : > { %v474_v30 = vpop.permute.xlu1 %473  ;;  %v441_v31 = vpop.permute.xlu0 %440 }
  0x87   : > { %1088 = vperm.xlu1 %1920, %v1893_v32   ;;  %v2137_v39 = vpop.permute.xlu2 %554 }
  0x89   : > { %v476_v34 = vpop.permute.xlu1 %475  ;;  %v443_v35 = vpop.permute.xlu0 %442 }
  0x8a   : > { %v448_v53 = vsel %vm446_vm0, %v443_v35, %v441_v31  ;;  %v447_v54 = vsel %vm446_vm0, %v441_v31, %v443_v35  ;;  %v479_v59 = vsel %vm477_vm1, %v476_v34, %v474_v30  ;;  %v478_v61 = vsel %vm477_vm1, %v474_v30, %v476_v34  ;;  %v724_v31 = vld [vmem:[%s2506_s4] sm:$0xff] }
  0x8b   : > { %v2172_v60 = vmul.f32 %v449_v50, %v448_v53  ;;  %v2178_v62 = vmul.f32 %v450_v52, %v447_v54  ;;  %v2185_v1 = vmul.f32 %v480_v55, %v479_v59  ;;  %v2192_v6 = vmul.f32 %v481_v58, %v478_v61 }
  0x8c   : > { %v645_v34 = vperm.slane %v2149_v48, 6  ;;  %v727_v43 = vsel %vm725_vm6, %v724_v31, 0 }
  0x8d   : > { %v459_v7 = vmul.f32 %v457_v26, %v2172_v60  ;;  %v460_v10 = vmul.f32 %v457_v26, %v2178_v62  ;;  %v491_v23 = vmul.f32 %v2127_v29, %v2185_v1  ;;  %v492_v24 = vmul.f32 %v2127_v29, %v2192_v6 }
  0x8e   : > { %v613_v26 = vperm.slane %v2154_v49, 5 }
  0x8f   : > { %1107 = vperm.xlu1 %1920, %v1894_v36   ;;  %v2142_v44 = vpop.permute.xlu2 %587  ;;  %v461_v25 = vadd.f32 %v459_v7, %v429_v63  ;;  %v462_v27 = vadd.f32 %v460_v10, %v430_v0 }
  0x91   : > { %v509_v37 = vpop.permute.xlu1 %508  ;;  %v507_v38 = vpop.permute.xlu0 %506 }
  0x92   : > { %v511_v8 = vsel %vm510_vm2, %v507_v38, %v509_v37  ;;  %v512_v9 = vsel %vm510_vm2, %v509_v37, %v507_v38 }
  0x93   : > { %v2211_v17 = vmul.f32 %v513_v3, %v512_v9  ;;  %v2215_v18 = vmul.f32 %v514_v5, %v511_v8  ;;  %v2278_v8 = vand.u32 4294901760, %v727_v43 }
  0x95   : > { %v524_v35 = vmul.f32 %v2132_v33, %v2211_v17  ;;  %v525_v36 = vmul.f32 %v2132_v33, %v2215_v18  ;;  %v493_v33 = vadd.f32 %v491_v23, %v461_v25 }
  0x97   : > { %1126 = vperm.xlu1 %1920, %v1895_v40   ;;  %v2158_v51 = vpop.permute.xlu2 %620  ;;  %v526_v61 = vadd.f32 %v524_v35, %v493_v33 }
  0x99   : > { %v542_v41 = vpop.permute.xlu1 %541  ;;  %v540_v42 = vpop.permute.xlu0 %539 }
  0x9a   : > { %v544_v19 = vsel %vm543_vm3, %v540_v42, %v542_v41  ;;  %v545_v20 = vsel %vm543_vm3, %v542_v41, %v540_v42  ;;  %v646_v42 = vperm.slane %v2154_v49, 6 }
  0x9b   : > { %v2235_v32 = vmul.f32 %v546_v11, %v545_v20  ;;  %v2239_v29 = vmul.f32 %v547_v12, %v544_v19 }
  0x9d   : > { %v557_v54 = vmul.f32 %v2137_v39, %v2235_v32 }
  0x9f   : > { %v2203_v13 = vpop.permute.xlu2 %653  ;;  %v559_v23 = vadd.f32 %v557_v54, %v526_v61 }
  0xa1   : > { %v575_v46 = vpop.permute.xlu1 %574  ;;  %v573_v47 = vpop.permute.xlu0 %572 }
  0xa2   : > { %v577_v28 = vsel %vm576_vm4, %v573_v47, %v575_v46  ;;  %v578_v30 = vsel %vm576_vm4, %v575_v46, %v573_v47  ;;  %v494_v46 = vadd.f32 %v492_v24, %v462_v27 }
  0xa3   : > { %v2253_v40 = vmul.f32 %v579_v14, %v577_v28  ;;  %v2257_v41 = vmul.f32 %v580_v15, %v578_v30  ;;  %v2305_v30 = vsub.f32 %v727_v43, %v2278_v8 }
  0xa4   : > { %v527_v63 = vadd.f32 %v525_v36, %v494_v46 }
  0xa5   : > { %v590_v9 = vmul.f32 %v2142_v44, %v2253_v40 }
  0xa7   : > { %v2292_v20 = vpop.permute.xlu2 %1023  ;;  %v592_v31 = vadd.f32 %v590_v9, %v559_v23 }
  0xa9   : > { %v608_v56 = vpop.permute.xlu1 %607  ;;  %v606_v57 = vpop.permute.xlu0 %605 }
  0xaa   : > { %v610_v37 = vsel %vm609_vm5, %v606_v57, %v608_v56  ;;  %v611_v38 = vsel %vm609_vm5, %v608_v56, %v606_v57  ;;  %v558_v56 = vmul.f32 %v2137_v39, %v2239_v29  ;;  %v591_v39 = vmul.f32 %v2142_v44, %v2257_v41 }
  0xab   : > { %v2271_v57 = vmul.f32 %v612_v16, %v610_v37  ;;  %v2275_v59 = vmul.f32 %v613_v26, %v611_v38 }
  0xac   : > { %v560_v24 = vadd.f32 %v558_v56, %v527_v63 }
  0xad   : > { %v623_v25 = vmul.f32 %v2158_v51, %v2271_v57  ;;  %v624_v44 = vmul.f32 %v2158_v51, %v2275_v59 }
  0xae   : > { %v593_v35 = vadd.f32 %v591_v39, %v560_v24 }
  0xaf   : > { %v625_v38 = vadd.f32 %v623_v25, %v592_v31 }
  0xb0   : > { %v626_v46 = vadd.f32 %v624_v44, %v593_v35 }
  0xb1   : > { %v641_v21 = vpop.permute.xlu1 %640  ;;  %v639_v22 = vpop.permute.xlu0 %638 }
  0xb2   : > { %v643_v47 = vsel %vm642_vm7, %v639_v22, %v641_v21  ;;  %v644_v53 = vsel %vm642_vm7, %v641_v21, %v639_v22  ;;  %v678_v21 = vperm.slane %v2149_v48, 7  ;;  %v679_v22 = vperm.slane %v2154_v49, 7 }
  0xb3   : > { %v2286_v10 = vmul.f32 %v645_v34, %v643_v47  ;;  %v2290_v19 = vmul.f32 %v646_v42, %v644_v53  ;;  %v2320_v53 = vand.u32 4294901760, %v2305_v30 }
  0xb5   : > { %v656_v36 = vmul.f32 %v2203_v13, %v2286_v10  ;;  %v657_v37 = vmul.f32 %v2203_v13, %v2290_v19  ;;  %v749_v23 = vsub.f32 %v2305_v30, %v2320_v53 }
  0xb7   : > { %v659_v54 = vadd.f32 %v657_v37, %v626_v46  ;;  %v658_v56 = vadd.f32 %v656_v36, %v625_v38  ;;  %v750_v35 = vand.u32 4294901760, %v749_v23 }
  0xb9   : > { %v674_v0 = vpop.permute.xlu1 %673  ;;  %v672_v7 = vpop.permute.xlu0 %671 }
  0xba   : > { %v676_v27 = vsel %vm675_vm8, %v672_v7, %v674_v0  ;;  %v677_v28 = vsel %vm675_vm8, %v674_v0, %v672_v7  ;;  %v467_v7 = vpop.permute.xlu2 %466 }
  0xbb   : > { %v2313_v51 = vmul.f32 %v678_v21, %v676_v27  ;;  %v2317_v33 = vmul.f32 %v679_v22, %v677_v28  ;;  %v469_v38 = vmul.f32 %v467_v7, %v2172_v60  ;;  %v470_v46 = vmul.f32 %v467_v7, %v2178_v62 }
  0xc1   : > { %v708_v43 = vpop.permute.xlu1 %707  ;;  %v687_v47 = vpop.permute.xlu0 %686 }
  0xc2   : > { %v689_v61 = vmul.f32 %v687_v47, %v2313_v51  ;;  %v690_v13 = vmul.f32 %v687_v47, %v2317_v33 }
  0xc4   : > { %v691_v63 = vadd.f32 %v689_v61, %v658_v56  ;;  %v692_v0 = vadd.f32 %v690_v13, %v659_v54 }
  0xc6   : > { %v710_v9 = vadd.f32 %v708_v43, %v691_v63  ;;  %v711_v39 = vadd.f32 %v708_v43, %v692_v0 }
  0xc8   : > { %v712_v24 = vmax.f32 %v710_v9, 0.0  ;;  %v713_v25 = vmax.f32 %v711_v39, 0.0 }
  0xc9   : > { %v436_v44 = vpop.permute.xlu1 %435  ;;  %v500_v27 = vpop.permute.xlu0 %499 }
  0xca   : > { %v438_v28 = vmul.f32 %v436_v44, %v2022_v2  ;;  %v439_v31 = vmul.f32 %v436_v44, %v2031_v4  ;;  %v744_v36 = vand.u32 4294901760, %v712_v24  ;;  %v890_v37 = vand.u32 4294901760, %v713_v25  ;;  %v1200_v2 = vld [vmem:[%s2511_s9] sm:$0xff]  ;;  %v566_v4 = vpop.permute.xlu2 %565 }
  0xcb   : > { %v502_v60 = vmul.f32 %v500_v27, %v2185_v1  ;;  %v503_v62 = vmul.f32 %v500_v27, %v2192_v6  ;;  %v1202_v39 = vsel %vm725_vm6, %v1200_v2, 0  ;;  %v568_v27 = vmul.f32 %v566_v4, %v2235_v32 }
  0xcc   : > { %745 = vmatpush.msra.mxu0 %v744_v36  ;;  %821 = vmatpush.msra.mxu3 %v744_v36  ;;  %v771_v43 = vsub.f32 %v712_v24, %v744_v36  ;;  %v917_v47 = vsub.f32 %v713_v25, %v890_v37  ;;  %v471_v54 = vadd.f32 %v469_v38, %v438_v28 }
  0xcd   : > { %v472_v56 = vadd.f32 %v470_v46, %v439_v31  ;;  %751 = vmatmul.f32.vlgmr.msra.gmra.mxu0 %v750_v35  ;;  %825 = vmatmul.f32.vlgmr.msra.gmra.mxu3 %v2320_v53  ;;  %v569_v28 = vmul.f32 %v566_v4, %v2239_v29  ;;  %v2342_v46 = vand.u32 4294901760, %v1202_v39 }
  0xce   : > { %798 = vmatpush.msra.mxu2 %v771_v43  ;;  %v772_v61 = vand.u32 4294901760, %v771_v43  ;;  %v918_v13 = vand.u32 4294901760, %v917_v47  ;;  %v504_v23 = vadd.f32 %v502_v60, %v471_v54 }
  0xcf   : > { %801 = vmatmul.f32.vlgmr.msra.gmra.mxu2 %v2305_v30  ;;  %v505_v24 = vadd.f32 %v503_v62, %v472_v56 }
  0xd0   : > { %891 = vmatpush.msrb.mxu2 %v890_v37  ;;  %847 = vmatpush.msrb.mxu0 %v772_v61  ;;  %v773_v7 = vsub.f32 %v771_v43, %v772_v61  ;;  %v919_v9 = vsub.f32 %v917_v47, %v918_v13 }
  0xd1   : > { %v533_v63 = vpop.permute.xlu1 %532  ;;  %v599_v0 = vpop.permute.xlu0 %598 }
  0xd2   : > { %993 = vmatpush.msra.mxu2 %v918_v13  ;;  %v535_v25 = vmul.f32 %v533_v63, %v2211_v17  ;;  %v536_v44 = vmul.f32 %v533_v63, %v2215_v18  ;;  %944 = vmatpush.msra.mxu0 %v917_v47  ;;  %v774_v1 = vand.u32 4294901760, %v773_v7  ;;  %v920_v6 = vand.u32 4294901760, %v919_v9  ;;  %v665_v32 = vpop.permute.xlu2 %664 }
  0xd3   : > { %v601_v17 = vmul.f32 %v599_v0, %v2253_v40  ;;  %v602_v18 = vmul.f32 %v599_v0, %v2257_v41  ;;  %v1222_v47 = vsub.f32 %v1202_v39, %v2342_v46  ;;  %v667_v13 = vmul.f32 %v665_v32, %v2286_v10 }
  0xd4   : > { %v537_v31 = vadd.f32 %v535_v25, %v504_v23  ;;  %v538_v38 = vadd.f32 %v536_v44, %v505_v24  ;;  %775 = vmatpush.msra.mxu1 %v774_v1  ;;  %921 = vmatpush.msrb.mxu3 %v920_v6  ;;  %v668_v40 = vmul.f32 %v665_v32, %v2290_v19 }
  0xd5   : > { %777 = vmatmul.f32.vlgmr.msra.gmra.mxu1 %v2278_v8  ;;  %849 = vmatmul.f32.vlgmr.msrb.gmra.mxu0 %v2278_v8  ;;  %v1223_v60 = vand.u32 4294901760, %v1222_v47 }
  0xd6   : > { %v570_v43 = vadd.f32 %v568_v27, %v537_v31  ;;  %v571_v54 = vadd.f32 %v569_v28, %v538_v38  ;;  %1015 = vmatpush.msra.mxu3 %v890_v37  ;;  %869 = vmatpush.msrb.mxu1 %v744_v36 }
  0xd7   : > { %923 = vmatmul.f32.vlgmr.msrb.gmra.mxu3 %v2278_v8  ;;  %897 = vmatmul.f32.vlgmr.msrb.gmra.mxu2 %v750_v35  ;;  %v1224_v19 = vsub.f32 %v1222_v47, %v1223_v60 }
  0xd8   : > { %967 = vmatpush.msra.mxu1 %v890_v37  ;;  %v603_v56 = vadd.f32 %v601_v17, %v570_v43  ;;  %v604_v2 = vadd.f32 %v602_v18, %v571_v54 }
  0xd9   : > { %v632_v29 = vpop.permute.xlu1 %631  ;;  %v698_v61 = vpop.permute.xlu0 %697  ;;  %v1225_v23 = vand.u32 4294901760, %v1224_v19  ;;  %v1898_v19 = vld [vmem:[%s2509_s7 + $0x40] sm:$0x3f] }
  0xda   : > { %v634_v4 = vmul.f32 %v632_v29, %v2271_v57  ;;  %v635_v36 = vmul.f32 %v632_v29, %v2275_v59  ;;  %v700_v62 = vmul.f32 %v698_v61, %v2313_v51  ;;  %v701_v35 = vmul.f32 %v698_v61, %v2317_v33 }
  0xdc   : > { %v636_v41 = vadd.f32 %v634_v4, %v603_v56  ;;  %v637_v37 = vadd.f32 %v635_v36, %v604_v2 }
  0xdd   : > { %871 = vmatmul.f32.vlgmr.msrb.gmra.mxu1 %v2278_v8  ;;  %947 = vmatmul.f32.vlgmr.msra.gmra.mxu0 %v2305_v30 }
  0xde   : > { %v669_v63 = vadd.f32 %v667_v13, %v636_v41  ;;  %v670_v0 = vadd.f32 %v668_v40, %v637_v37 }
  0xdf   : > { %1017 = vmatmul.f32.vlgmr.msra.gmra.mxu3 %v2278_v8  ;;  %995 = vmatmul.f32.vlgmr.msra.gmra.mxu2 %v2278_v8 }
  0xe0   : > { %v702_v57 = vadd.f32 %v700_v62, %v669_v63  ;;  %v703_v59 = vadd.f32 %v701_v35, %v670_v0  ;;  %v1896_v63 = vld [vmem:[%s2509_s7 + $0x30] sm:$0x3f] }
  0xe1   : > { %v718_v10 = vpop.permute.xlu1 %717 }
  0xe2   : > { %v720_v7 = vadd.f32 %v718_v10, %v702_v57  ;;  %v721_v9 = vadd.f32 %v718_v10, %v703_v59  ;;  %v1897_v10 = vld [vmem:[%s2509_s7 + $0x38] sm:$0x3f] }
  0xe4   : > { %v722_v39 = vmax.f32 %v720_v7, 0.0  ;;  %v723_v51 = vmax.f32 %v721_v9, 0.0  ;;  %v1190_v7 = vld [vmem:[%s2510_s8] sm:$0x3f] }
  0xe5   : > { %971 = vmatmul.f32.vlgmr.msra.gmra.mxu1 %v2320_v53 }
  0xe6   : > { %v1219_v33 = vand.u32 4294901760, %v722_v39  ;;  %v1365_v24 = vand.u32 4294901760, %v723_v51 }
  0xe8   : > { %v1246_v25 = vsub.f32 %v722_v39, %v1219_v33  ;;  %v1392_v44 = vsub.f32 %v723_v51, %v1365_v24  ;;  %1220 = vmatpush.msrb.mxu0 %v1219_v33  ;;  %1296 = vmatpush.msrb.mxu3 %v1219_v33 }
  0xe9   : > { %1226 = vmatmul.f32.vlgmr.msrb.gmra.mxu0 %v1225_v23  ;;  %1300 = vmatmul.f32.vlgmr.msrb.gmra.mxu3 %v1223_v60  ;;  %v1051_v51 = vpop.permute.xlu1 %1050 }
  0xea   : > { %1273 = vmatpush.msrb.mxu2 %v1246_v25  ;;  %v1247_v30 = vand.u32 4294901760, %v1246_v25  ;;  %v1393_v1 = vand.u32 4294901760, %v1392_v44 }
  0xeb   : > { %1276 = vmatmul.f32.vlgmr.msrb.gmra.mxu2 %v1222_v47 }
  0xec   : > { %1366 = vmatpush.msra.mxu2 %v1365_v24  ;;  %1322 = vmatpush.msra.mxu0 %v1247_v30  ;;  %v1248_v8 = vsub.f32 %v1246_v25, %v1247_v30  ;;  %v1394_v6 = vsub.f32 %v1392_v44, %v1393_v1 }
  0xee   : > { %1468 = vmatpush.msrb.mxu2 %v1393_v1  ;;  %1419 = vmatpush.msrb.mxu0 %v1392_v44  ;;  %v1249_v27 = vand.u32 4294901760, %v1248_v8  ;;  %v1395_v28 = vand.u32 4294901760, %v1394_v6 }
  0xf0   : > { %1250 = vmatpush.msrb.mxu1 %v1249_v27  ;;  %1396 = vmatpush.msra.mxu3 %v1395_v28 }
  0xf1   : > { %1252 = vmatmul.f32.vlgmr.msrb.gmra.mxu1 %v2342_v46  ;;  %1324 = vmatmul.f32.vlgmr.msra.gmra.mxu0 %v2342_v46 }
  0xf2   : > { %1490 = vmatpush.msrb.mxu3 %v1365_v24  ;;  %1344 = vmatpush.msra.mxu1 %v1219_v33  ;;  %v1070_v33 = vpop.permute.xlu1 %1069 }
  0xf3   : > { %1398 = vmatmul.f32.vlgmr.msra.gmra.mxu3 %v2342_v46  ;;  %1372 = vmatmul.f32.vlgmr.msra.gmra.mxu2 %v1225_v23 }
  0xf4   : > { %1442 = vmatpush.msrb.mxu1 %v1365_v24  ;;  %v1035_v24 = vpop.permute.xlu0 %1034 }
  0xf9   : > { %1346 = vmatmul.f32.vlgmr.msra.gmra.mxu1 %v2342_v46  ;;  %1422 = vmatmul.f32.vlgmr.msrb.gmra.mxu0 %v1222_v47 }
  0xfa   : > { %v1089_v44 = vpop.permute.xlu1 %1088 }
  0xfb   : > { %1492 = vmatmul.f32.vlgmr.msrb.gmra.mxu3 %v2342_v46  ;;  %1470 = vmatmul.f32.vlgmr.msrb.gmra.mxu2 %v2342_v46 }
 0x101   : > { %1446 = vmatmul.f32.vlgmr.msrb.gmra.mxu1 %v1223_v60 }
 0x102   : > { %v1108_v8 = vpop.permute.xlu1 %1107 }
 0x10a   : > { %v1127_v28 = vpop.permute.xlu1 %1126 }
 0x14a   : > { %v752_v53 = vpop.f32.mrf.mxu0 }
 0x150   : > { %v826_v31 = vpop.f32.mrf.mxu3 }
 0x152   : > { %v778_v38 = vpop.f32.mrf.mxu1  ;;  %v802_v54 = vpop.f32.mrf.mxu2 }
 0x153   : > { %v779_v43 = vadd.f32 %v778_v38, %v752_v53  ;;  %v850_v17 = vpop.f32.mrf.mxu0 }
 0x155   : > { %v803_v18 = vadd.f32 %v802_v54, %v779_v43 }
 0x157   : > { %v827_v32 = vadd.f32 %v826_v31, %v803_v18 }
 0x159   : > { %v851_v29 = vadd.f32 %v850_v17, %v827_v32 }
 0x15a   : > { %v872_v56 = vpop.f32.mrf.mxu1  ;;  %v924_v2 = vpop.f32.mrf.mxu3 }
 0x15b   : > { %v2367_v4 = vadd.f32 %v872_v56, %v851_v29  ;;  %v898_v36 = vpop.f32.mrf.mxu2  ;;  %v948_v46 = vpop.f32.mrf.mxu0 }
 0x15c   : > { %v925_v61 = vadd.f32 %v924_v2, %v898_v36 }
 0x15d   : > { %v1026_v47 = vadd.f32 %v2292_v20, %v2367_v4 }
 0x15e   : > { %v949_v40 = vadd.f32 %v948_v46, %v925_v61 }
 0x15f   : > { %v2371_v13 = vmax.f32 %v1026_v47, 0.0 }
 0x161   : > { %1057 = vrot.lane.b32.xlu1 %v2371_v13, %s1930_s14  ;;  %1039 = vrot.lane.b32.xlu2 %v2371_v13, %s1931_s15 }
 0x162   : > { %v972_v41 = vpop.f32.mrf.mxu1  ;;  %v1018_v62 = vpop.f32.mrf.mxu3 }
 0x163   : > { %v973_v37 = vadd.f32 %v972_v41, %v949_v40  ;;  %v996_v60 = vpop.f32.mrf.mxu2  ;;  %v1037_v40 = vmul.f32 %v1035_v24, %v2371_v13 }
 0x165   : > { %v997_v35 = vadd.f32 %v996_v60, %v973_v37 }
 0x167   : > { %v2380_v0 = vadd.f32 %v1018_v62, %v997_v35 }
 0x169   : > { %v1027_v57 = vadd.f32 %v2292_v20, %v2380_v0  ;;  %1145 = vperm.xlu1 %1920, %v1896_v63   ;;  %1076 = vrot.lane.b32.xlu2 %v2371_v13, %s1932_s20 }
 0x16b   : > { %v1029_v59 = vmax.f32 %v1027_v57, 0.0 }
 0x16d   : > { %1041 = vrot.lane.b32.xlu0 %v1029_v59, %s1931_s15  ;;  %s2520_s15 = smov 112   ;;  %v1038_v60 = vmul.f32 %v1035_v24, %v1029_v59 }
 0x171   : > { %1164 = vperm.xlu1 %1920, %v1897_v10   ;;  %1095 = vrot.lane.b32.xlu2 %v2371_v13, %s1933_s24 }
 0x175   : > { %1078 = vrot.lane.b32.xlu0 %v1029_v59, %s1932_s20  ;;  %s2521_s20 = smov 111  }
 0x179   : > { %1114 = vrot.lane.b32.xlu2 %v2371_v13, %s1934_s29 }
 0x17d   : > { %1097 = vrot.lane.b32.xlu0 %v1029_v59, %s1933_s24 }
 0x181   : > { %1133 = vrot.lane.b32.xlu2 %v2371_v13, %s1935_s16 }
 0x185   : > { %1116 = vrot.lane.b32.xlu0 %v1029_v59, %s1934_s29 }
 0x189   : > { %1152 = vrot.lane.b32.xlu2 %v2371_v13, %s2520_s15 }
 0x18d   : > { %1135 = vrot.lane.b32.xlu0 %v1029_v59, %s1935_s16 }
 0x191   : > { %1059 = vrot.lane.b32.xlu2 %v1029_v59, %s1930_s14 }
 0x195   : > { %1154 = vrot.lane.b32.xlu0 %v1029_v59, %s2520_s15 }
 0x199   : > { %1171 = vrot.lane.b32.xlu2 %v2371_v13, %s2521_s20 }
 0x19d   : > { %1173 = vrot.lane.b32.xlu0 %v1029_v59, %s2521_s20 }
 0x1a1   : > { %1183 = vperm.xlu2 %1918, %v1898_v19  }
 0x1a5   : > { %1193 = vperm.xlu0 %1919, %v1190_v7  }
 0x1bb   : > { %v1040_v9 = vpop.permute.xlu2 %1039 }
 0x1c3   : > { %v1077_v39 = vpop.permute.xlu2 %1076 }
 0x1cb   : > { %v1096_v23 = vpop.permute.xlu2 %1095 }
 0x1d3   : > { %v1115_v25 = vpop.permute.xlu2 %1114  ;;  %v1058_v43 = vpop.permute.xlu1 %1057 }
 0x1db   : > { %v1134_v1 = vpop.permute.xlu2 %1133  ;;  %v1146_v10 = vpop.permute.xlu1 %1145 }
 0x1df   : > { %v1042_v30 = vpop.permute.xlu0 %1041 }
 0x1e0   : > { %v1044_v38 = vsel %vm446_vm0, %v1042_v30, %v1040_v9  ;;  %v1043_v54 = vsel %vm446_vm0, %v1040_v9, %v1042_v30 }
 0x1e1   : > { %v1045_v32 = vmul.f32 %v1044_v38, %v449_v50  ;;  %v1046_v56 = vmul.f32 %v1043_v54, %v450_v52 }
 0x1e3   : > { %v1153_v27 = vpop.permute.xlu2 %1152  ;;  %v1053_v47 = vmul.f32 %v1051_v51, %v1045_v32  ;;  %v1054_v61 = vmul.f32 %v1051_v51, %v1046_v56 }
 0x1e5   : > { %v1055_v62 = vadd.f32 %v1053_v47, %v1037_v40  ;;  %v1056_v35 = vadd.f32 %v1054_v61, %v1038_v60 }
 0x1e7   : > { %v1079_v6 = vpop.permute.xlu0 %1078 }
 0x1e8   : > { %v1081_v46 = vsel %vm510_vm2, %v1079_v6, %v1077_v39  ;;  %v1080_v50 = vsel %vm510_vm2, %v1077_v39, %v1079_v6 }
 0x1e9   : > { %v1083_v63 = vmul.f32 %v1080_v50, %v514_v5 }
 0x1eb   : > { %v1060_v31 = vpop.permute.xlu2 %1059  ;;  %v1092_v5 = vmul.f32 %v1089_v44, %v1083_v63 }
 0x1ec   : > { %v1062_v18 = vsel %vm477_vm1, %v1060_v31, %v1058_v43  ;;  %v1061_v29 = vsel %vm477_vm1, %v1058_v43, %v1060_v31 }
 0x1ed   : > { %v1063_v2 = vmul.f32 %v1062_v18, %v480_v55  ;;  %v1064_v36 = vmul.f32 %v1061_v29, %v481_v58  ;;  %v1082_v55 = vmul.f32 %v1081_v46, %v513_v3 }
 0x1ef   : > { %v1098_v53 = vpop.permute.xlu0 %1097  ;;  %v1072_v41 = vmul.f32 %v1070_v33, %v1063_v2  ;;  %v1073_v52 = vmul.f32 %v1070_v33, %v1064_v36  ;;  %v1091_v9 = vmul.f32 %v1089_v44, %v1082_v55  ;;  %v1165_v2 = vpop.permute.xlu1 %1164 }
 0x1f0   : > { %v1100_v58 = vsel %vm543_vm3, %v1098_v53, %v1096_v23  ;;  %v1099_v13 = vsel %vm543_vm3, %v1096_v23, %v1098_v53 }
 0x1f1   : > { %v1074_v57 = vadd.f32 %v1072_v41, %v1055_v62  ;;  %v1075_v19 = vadd.f32 %v1073_v52, %v1056_v35  ;;  %v1101_v59 = vmul.f32 %v1100_v58, %v546_v11  ;;  %v1102_v39 = vmul.f32 %v1099_v13, %v547_v12  ;;  %v1498_v11 = vld [vmem:[%s2512_s10] sm:$0xff] }
 0x1f2   : > { %v1501_v43 = vsel %vm1499_vm9, %v1498_v11, 0 }
 0x1f3   : > { %v1093_v33 = vadd.f32 %v1091_v9, %v1074_v57  ;;  %v1094_v44 = vadd.f32 %v1092_v5, %v1075_v19  ;;  %v1110_v30 = vmul.f32 %v1108_v8, %v1101_v59  ;;  %v1172_v6 = vpop.permute.xlu2 %1171  ;;  %v1111_v31 = vmul.f32 %v1108_v8, %v1102_v39 }
 0x1f4   : > { %v2473_v32 = vand.u32 4294901760, %v1501_v43 }
 0x1f5   : > { %v1112_v29 = vadd.f32 %v1110_v30, %v1093_v33 }
 0x1f7   : > { %v1117_v17 = vpop.permute.xlu0 %1116 }
 0x1f8   : > { %v1118_v7 = vsel %vm576_vm4, %v1115_v25, %v1117_v17  ;;  %v1119_v3 = vsel %vm576_vm4, %v1117_v17, %v1115_v25 }
 0x1f9   : > { %v1120_v24 = vmul.f32 %v1118_v7, %v579_v14  ;;  %v1121_v25 = vmul.f32 %v1119_v3, %v580_v15 }
 0x1fb   : > { %v1129_v54 = vmul.f32 %v1127_v28, %v1120_v24  ;;  %v1130_v15 = vmul.f32 %v1127_v28, %v1121_v25  ;;  %v1227_v24 = vpop.f32.mrf.mxu0  ;;  %v1301_v25 = vpop.f32.mrf.mxu3 }
 0x1ff   : > { %v1136_v37 = vpop.permute.xlu0 %1135 }
 0x200   : > { %v1137_v51 = vsel %vm609_vm5, %v1134_v1, %v1136_v37  ;;  %v1138_v23 = vsel %vm609_vm5, %v1136_v37, %v1134_v1  ;;  %v1184_v37 = vpop.permute.xlu2 %1183 }
 0x201   : > { %v1139_v38 = vmul.f32 %v1137_v51, %v612_v16  ;;  %v1140_v14 = vmul.f32 %v1138_v23, %v613_v26  ;;  %v1131_v16 = vadd.f32 %v1129_v54, %v1112_v29 }
 0x203   : > { %v1148_v8 = vmul.f32 %v1146_v10, %v1139_v38  ;;  %v1149_v56 = vmul.f32 %v1146_v10, %v1140_v14  ;;  %v1325_v30 = vpop.f32.mrf.mxu0 }
 0x205   : > { %v1150_v50 = vadd.f32 %v1148_v8, %v1131_v16 }
 0x207   : > { %v1155_v12 = vpop.permute.xlu0 %1154 }
 0x208   : > { %v1156_v53 = vsel %vm642_vm7, %v1153_v27, %v1155_v12  ;;  %v1157_v1 = vsel %vm642_vm7, %v1155_v12, %v1153_v27  ;;  %v1113_v27 = vadd.f32 %v1111_v31, %v1094_v44  ;;  %v1253_v12 = vpop.f32.mrf.mxu1  ;;  %v1277_v44 = vpop.f32.mrf.mxu2 }
 0x209   : > { %v1158_v17 = vmul.f32 %v1156_v53, %v645_v34  ;;  %v1159_v18 = vmul.f32 %v1157_v1, %v646_v42  ;;  %v1528_v42 = vsub.f32 %v1501_v43, %v2473_v32  ;;  %v1254_v38 = vadd.f32 %v1253_v12, %v1227_v24 }
 0x20a   : > { %v1132_v36 = vadd.f32 %v1130_v15, %v1113_v27 }
 0x20b   : > { %v1167_v47 = vmul.f32 %v1165_v2, %v1158_v17  ;;  %v1168_v26 = vmul.f32 %v1165_v2, %v1159_v18  ;;  %v1529_v58 = vand.u32 4294901760, %v1528_v42  ;;  %v1423_v31 = vpop.f32.mrf.mxu0  ;;  %v1278_v15 = vadd.f32 %v1277_v44, %v1254_v38 }
 0x20c   : > { %v1151_v41 = vadd.f32 %v1149_v56, %v1132_v36 }
 0x20d   : > { %v1169_v60 = vadd.f32 %v1167_v47, %v1150_v50  ;;  %v1530_v10 = vsub.f32 %v1528_v42, %v1529_v58  ;;  %v1302_v18 = vadd.f32 %v1301_v25, %v1278_v15 }
 0x20e   : > { %v1170_v52 = vadd.f32 %v1168_v26, %v1151_v41 }
 0x20f   : > { %v1174_v61 = vpop.permute.xlu0 %1173 }
 0x210   : > { %v1175_v28 = vsel %vm675_vm8, %v1172_v6, %v1174_v61  ;;  %v1176_v34 = vsel %vm675_vm8, %v1174_v61, %v1172_v6  ;;  %v1399_v6 = vpop.f32.mrf.mxu3  ;;  %v1347_v53 = vpop.f32.mrf.mxu1 }
 0x211   : > { %v1177_v46 = vmul.f32 %v1175_v28, %v678_v21  ;;  %v1178_v40 = vmul.f32 %v1176_v34, %v679_v22  ;;  %v1531_v22 = vand.u32 4294901760, %v1530_v10  ;;  %v1373_v1 = vpop.f32.mrf.mxu2 }
 0x212   : > { %v1400_v8 = vadd.f32 %v1399_v6, %v1373_v1 }
 0x213   : > { %v1186_v62 = vmul.f32 %v1184_v37, %v1177_v46  ;;  %v1187_v55 = vmul.f32 %v1184_v37, %v1178_v40 }
 0x214   : > { %v1424_v26 = vadd.f32 %v1423_v31, %v1400_v8 }
 0x215   : > { %v1188_v35 = vadd.f32 %v1186_v62, %v1169_v60  ;;  %v1189_v63 = vadd.f32 %v1187_v55, %v1170_v52 }
 0x217   : > { %v1194_v45 = vpop.permute.xlu0 %1193 }
 0x218   : > { %v1196_v13 = vadd.f32 %v1194_v45, %v1188_v35  ;;  %v1197_v57 = vadd.f32 %v1194_v45, %v1189_v63  ;;  %v1493_v14 = vpop.f32.mrf.mxu3  ;;  %v1447_v43 = vpop.f32.mrf.mxu1 }
 0x219   : > { %v1471_v17 = vpop.f32.mrf.mxu2  ;;  %v1448_v40 = vadd.f32 %v1447_v43, %v1424_v26 }
 0x21a   : > { %v1198_v48 = vmax.f32 %v1196_v13, 0.0  ;;  %v1199_v21 = vmax.f32 %v1197_v57, 0.0 }
 0x21b   : > { %v1472_v62 = vadd.f32 %v1471_v17, %v1448_v40 }
 0x21c   : > { %v1505_v19 = vsel %vm1503_vm10, %v1198_v48, 0  ;;  %v1508_v49 = vsel %vm1503_vm10, %v1199_v21, 0 }
 0x21d   : > { %v1525_v59 = vand.u32 4294901760, %v1505_v19  ;;  %v1671_v7 = vand.u32 4294901760, %v1508_v49  ;;  %v1494_v45 = vadd.f32 %v1493_v14, %v1472_v62 }
 0x21f   : > { %v1552_v3 = vsub.f32 %v1505_v19, %v1525_v59  ;;  %v1698_v9 = vsub.f32 %v1508_v49, %v1671_v7  ;;  %1526 = vmatpush.msra.mxu0 %v1525_v59  ;;  %1602 = vmatpush.msra.mxu3 %v1525_v59  ;;  %v1497_v48 = vadd.f32 %v1494_v45, %v2380_v0 }
 0x220   : > { %1532 = vmatmul.f32.vlgmr.msra.gmra.mxu0 %v1531_v22  ;;  %1606 = vmatmul.f32.vlgmr.msra.gmra.mxu3 %v1529_v58 }
 0x221   : > { %1579 = vmatpush.msra.mxu2 %v1552_v3  ;;  %v1553_v39 = vand.u32 4294901760, %v1552_v3  ;;  %v1699_v5 = vand.u32 4294901760, %v1698_v9 }
 0x222   : > { %1582 = vmatmul.f32.vlgmr.msra.gmra.mxu2 %v1528_v42 }
 0x223   : > { %1672 = vmatpush.msrb.mxu2 %v1671_v7  ;;  %1628 = vmatpush.msrb.mxu0 %v1553_v39  ;;  %v1554_v51 = vsub.f32 %v1552_v3, %v1553_v39  ;;  %v1700_v23 = vsub.f32 %v1698_v9, %v1699_v5 }
 0x225   : > { %1774 = vmatpush.msra.mxu2 %v1699_v5  ;;  %1725 = vmatpush.msra.mxu0 %v1698_v9  ;;  %v1555_v11 = vand.u32 4294901760, %v1554_v51  ;;  %v1701_v33 = vand.u32 4294901760, %v1700_v23 }
 0x227   : > { %1556 = vmatpush.msra.mxu1 %v1555_v11  ;;  %1702 = vmatpush.msrb.mxu3 %v1701_v33 }
 0x228   : > { %1558 = vmatmul.f32.vlgmr.msra.gmra.mxu1 %v2473_v32  ;;  %1630 = vmatmul.f32.vlgmr.msrb.gmra.mxu0 %v2473_v32 }
 0x229   : > { %1796 = vmatpush.msra.mxu3 %v1671_v7  ;;  %1650 = vmatpush.msrb.mxu1 %v1525_v59 }
 0x22a   : > { %1704 = vmatmul.f32.vlgmr.msrb.gmra.mxu3 %v2473_v32  ;;  %1678 = vmatmul.f32.vlgmr.msrb.gmra.mxu2 %v1531_v22 }
 0x22b   : > { %1748 = vmatpush.msra.mxu1 %v1671_v7 }
 0x230   : > { %1652 = vmatmul.f32.vlgmr.msrb.gmra.mxu1 %v2473_v32  ;;  %1728 = vmatmul.f32.vlgmr.msra.gmra.mxu0 %v1528_v42 }
 0x232   : > { %1798 = vmatmul.f32.vlgmr.msra.gmra.mxu3 %v2473_v32  ;;  %1776 = vmatmul.f32.vlgmr.msra.gmra.mxu2 %v2473_v32  ;;  %v1326_v32 = vadd.f32 %v1325_v30, %v1302_v18 }
 0x234   : > { %v1348_v47 = vadd.f32 %v1347_v53, %v1326_v32 }
 0x236   : > { %v1496_v46 = vadd.f32 %v1348_v47, %v2367_v4 }
 0x238   : > { %1752 = vmatmul.f32.vlgmr.msra.gmra.mxu1 %v1529_v58 }
 0x29d   : > { %v1533_v54 = vpop.f32.mrf.mxu0 }
 0x2a3   : > { %v1607_v29 = vpop.f32.mrf.mxu3 }
 0x2a5   : > { %v1559_v27 = vpop.f32.mrf.mxu1  ;;  %v1583_v2 = vpop.f32.mrf.mxu2 }
 0x2a6   : > { %v1560_v56 = vadd.f32 %v1559_v27, %v1533_v54  ;;  %v1631_v16 = vpop.f32.mrf.mxu0 }
 0x2a8   : > { %v1584_v36 = vadd.f32 %v1583_v2, %v1560_v56 }
 0x2aa   : > { %v1608_v61 = vadd.f32 %v1607_v29, %v1584_v36 }
 0x2ac   : > { %v1632_v28 = vadd.f32 %v1631_v16, %v1608_v61 }
 0x2ad   : > { %v1653_v34 = vpop.f32.mrf.mxu1  ;;  %v1705_v42 = vpop.f32.mrf.mxu3 }
 0x2ae   : > { %v1654_v50 = vadd.f32 %v1653_v34, %v1632_v28  ;;  %v1679_v41 = vpop.f32.mrf.mxu2  ;;  %v1729_v52 = vpop.f32.mrf.mxu0 }
 0x2af   : > { %v1706_v60 = vadd.f32 %v1705_v42, %v1679_v41 }
 0x2b0   : > { %v1802_v37 = vadd.f32 %v1654_v50, %v1496_v46 }
 0x2b1   : > { %v1730_v35 = vadd.f32 %v1729_v52, %v1706_v60 }
 0x2b2   : > { %v1804_v55 = vadd.f32 %v1802_v37, %v2292_v20 }
 0x2b4   : > { %v1806_v58 = vmax.f32 %v1804_v55, 0.0 }
 0x2b5   : > { %v1753_v63 = vpop.f32.mrf.mxu1  ;;  %v1799_v57 = vpop.f32.mrf.mxu3 }
 0x2b6   : > { %1808 = vst [vmem:[%s415_s13] sm:$0xff] %v1806_v58  ;;  %v1754_v4 = vadd.f32 %v1753_v63, %v1730_v35  ;;  %v1777_v13 = vpop.f32.mrf.mxu2 }
 0x2b8   : > { %v1778_v10 = vadd.f32 %v1777_v13, %v1754_v4 }
 0x2ba   : > { %v1800_v21 = vadd.f32 %v1799_v57, %v1778_v10 }
 0x2bc   : > { %v1803_v19 = vadd.f32 %v1800_v21, %v1497_v48 }
 0x2be   : > { %v1805_v49 = vadd.f32 %v1803_v19, %v2292_v20 }
 0x2c0   : > { %v1807_v22 = vmax.f32 %v1805_v49, 0.0 }
 0x2c2   : > { %1809 = vst [vmem:[%s415_s13 + $0x8] sm:$0xff] %v1807_v22 }
 0x2c3 PF: > { %s22_s21 = sadd.s32 1, %s1927_s21  }
 0x2c4   : > { %p19_p4 = scmp.ge.s32.totalorder %s22_s21, 4  }
 0x2c6   :  { %21 = sbr.rel (!%p19_p4) target bundleno = 1 (0x1), region = 122 }

</bundles_post_ra>
